<compile_context>
chip_gen: v7x
topology: tpu7x:2x2x1
jax: 0.10.0
libtpu: 0.0.40
codegen_flags: <defaults>
</compile_context>

<pallas_src>
import jax
import jax.numpy as jnp
from jax.experimental import pallas as pl
from jax.experimental.pallas import tpu as pltpu

LANE = 128  # lane (last-dim) width; hidden dims padded to multiples of this


def _round_up(x, m):
    return (x + m - 1) // m * m


def _pick_tile(dim, cands=(512, 256, 128)):
    for t in cands:
        if dim % t == 0:
            return t
    return dim


def _pick_row_tile(n_pad):
    """Largest tile in {512,256,128} dividing n_pad with >=2 row programs
    (so the 'parallel' axis can be split across both v7x TensorCores);
    falls back to a single-program tile for tiny graphs."""
    for t in (512, 256, 128):
        if n_pad % t == 0 and n_pad // t >= 2:
            return t
    for t in (512, 256, 128):
        if n_pad % t == 0:
            return t
    return n_pad


def _vmem_limit_bytes():
    """VMEM-capacity-aware scoped limit: ~3/4 of physical, capped at 64 MiB
    (v5e/v6e: 64 MiB; v7x with 64 MiB/TC: 48 MiB). Conservative fallback."""
    cap = None
    try:
        cap = getattr(pltpu.get_tpu_info(), "vmem_capacity_bytes", None)
    except Exception:
        cap = None
    if cap is None:
        return 48 * 1024 * 1024
    return int(min(cap - cap // 4, 64 * 1024 * 1024))


VMEM_LIMIT = _vmem_limit_bytes()


def _pad2d(a, rows, cols):
    r, c = a.shape
    return jnp.pad(a.astype(jnp.float32), ((0, rows - r), (0, cols - c)))


# ---------------------------------------------------------------------------
# Kernel 1 (fused GCN layer):  out = prelu(A @ (X @ W) + b)
#   grid = (row_tiles, k_tiles); per step the XW k-tile is recomputed on the
#   MXU (cheap, keeps row axis stateless -> "parallel") and fed into the
#   f32 aggregation accumulator; init at k==0, bias+PReLU finalize at last k.
# ---------------------------------------------------------------------------
def _gcn_fused_kernel(a_ref, x_ref, w_ref, b_ref, alpha_ref, o_ref, acc_ref):
    k = pl.program_id(1)

    @pl.when(k == 0)
    def _():
        acc_ref[...] = jnp.zeros_like(acc_ref)

    xw = jnp.dot(x_ref[...], w_ref[...], preferred_element_type=jnp.float32)
    acc_ref[...] += jnp.dot(a_ref[...], xw.astype(jnp.bfloat16),
                            preferred_element_type=jnp.float32)

    @pl.when(k == pl.num_programs(1) - 1)
    def _():
        h = acc_ref[...] + b_ref[...]
        o_ref[...] = jnp.where(h > 0, h, alpha_ref[...] * h).astype(o_ref.dtype)


def gcn_layer_fused(a_pad, x_pad, w_pad, b_row, alpha_row):
    """One fused GCN layer on padded inputs. Returns padded (n_pad, c_pad) bf16."""
    n = a_pad.shape[0]
    f = x_pad.shape[1]
    c = w_pad.shape[1]
    tm = _pick_row_tile(n)
    tk = _pick_tile(n)
    gm, gk = n // tm, n // tk
    flops = 2 * n * n * c + 2 * gm * n * f * c
    bytes_accessed = n * n * 2 + gm * n * f * 2 + f * c * 2 + n * c * 2
    return pl.pallas_call(
        _gcn_fused_kernel,
        out_shape=jax.ShapeDtypeStruct((n, c), jnp.bfloat16),
        grid_spec=pltpu.PrefetchScalarGridSpec(
            num_scalar_prefetch=0,
            grid=(gm, gk),
            in_specs=[
                pl.BlockSpec((tm, tk), lambda i, k: (i, k)),   # A row/col tile
                pl.BlockSpec((tk, f), lambda i, k: (k, 0)),    # X k-tile (layer input rows)
                pl.BlockSpec((f, c), lambda i, k: (0, 0)),     # W (VMEM-resident)
                pl.BlockSpec((1, c), lambda i, k: (0, 0)),     # bias row
                pl.BlockSpec((1, c), lambda i, k: (0, 0)),     # PReLU alpha row
            ],
            out_specs=pl.BlockSpec((tm, c), lambda i, k: (i, 0)),
            scratch_shapes=[pltpu.VMEM((tm, c), jnp.float32)],
        ),
        compiler_params=pltpu.CompilerParams(
            dimension_semantics=("parallel", "arbitrary"),
            vmem_limit_bytes=VMEM_LIMIT,
        ),
        cost_estimate=pl.CostEstimate(flops=flops, transcendentals=0,
                                      bytes_accessed=bytes_accessed),
    )(a_pad, x_pad, w_pad, b_row, alpha_row)


# ---------------------------------------------------------------------------
# Kernel 2 (pairwise DNN head):
#   out = prelu(x1@W1a + x2@W1b + b1) @ W2p + b2p
# (W1 pre-split so the concatenated pairs tensor is never materialized;
#  W2 padded to 128 lanes so the final matmul/store is lane-dense.)
# ---------------------------------------------------------------------------
def _dnn_head_kernel(x1_ref, x2_ref, w1a_ref, w1b_ref, b1_ref, alpha_ref,
                     w2_ref, b2_ref, o_ref):
    h = jnp.dot(x1_ref[...], w1a_ref[...], preferred_element_type=jnp.float32)
    h = h + jnp.dot(x2_ref[...], w1b_ref[...], preferred_element_type=jnp.float32)
    h = h + b1_ref[...]
    h = jnp.where(h > 0, h, alpha_ref[...] * h)
    o_ref[...] = (jnp.dot(h.astype(jnp.bfloat16), w2_ref[...],
                          preferred_element_type=jnp.float32) + b2_ref[...])


def dnn_head(x1, x2, w1a, w1b, b1_row, alpha_row, w2_pad, b2_row):
    e, c = x1.shape
    d = w1a.shape[1]
    te = _pick_tile(e, (256, 128))    # 256-row tiles fill the v6e/v7x MXU
    ge = e // te
    flops = 2 * e * c * d * 2 + 2 * e * d * LANE
    bytes_accessed = 2 * e * c * 2 + (2 * c * d + d * LANE) * 2 + e * LANE * 4
    return pl.pallas_call(
        _dnn_head_kernel,
        out_shape=jax.ShapeDtypeStruct((e, LANE), jnp.float32),
        grid_spec=pltpu.PrefetchScalarGridSpec(
            num_scalar_prefetch=0,
            grid=(ge,),
            in_specs=[
                pl.BlockSpec((te, c), lambda i: (i, 0)),
                pl.BlockSpec((te, c), lambda i: (i, 0)),
                pl.BlockSpec((c, d), lambda i: (0, 0)),
                pl.BlockSpec((c, d), lambda i: (0, 0)),
                pl.BlockSpec((1, d), lambda i: (0, 0)),
                pl.BlockSpec((1, d), lambda i: (0, 0)),
                pl.BlockSpec((d, LANE), lambda i: (0, 0)),
                pl.BlockSpec((1, LANE), lambda i: (0, 0)),
            ],
            out_specs=pl.BlockSpec((te, LANE), lambda i: (i, 0)),
        ),
        compiler_params=pltpu.CompilerParams(
            dimension_semantics=("parallel",),
            vmem_limit_bytes=VMEM_LIMIT,
        ),
        cost_estimate=pl.CostEstimate(flops=flops, transcendentals=0,
                                      bytes_accessed=bytes_accessed),
    )(x1, x2, w1a, w1b, b1_row, alpha_row, w2_pad, b2_row)


# ---------------------------------------------------------------------------
# Glue (plain JAX, fuses under jit): dense symmetric GCN normalization,
# PyG-style add_remaining_self_loops (only add a self-loop where none exists).
# ---------------------------------------------------------------------------
def gcn_norm_dense(edge_index, edge_weight, num_nodes):
    src = edge_index[0]
    tgt = edge_index[1]
    # A[i, j] = total weight of edges j -> i (duplicate edges sum, like sparse MP)
    a = jnp.zeros((num_nodes, num_nodes), jnp.float32).at[tgt, src].add(
        edge_weight.astype(jnp.float32))
    diag = jnp.diagonal(a)
    a = a + jnp.diag(jnp.where(diag == 0, 1.0, 0.0))   # add_remaining_self_loops
    deg = a.sum(axis=1)
    dinv = jnp.where(deg > 0, 1.0 / jnp.sqrt(deg), 0.0)
    return dinv[:, None] * a * dinv[None, :]


# TODO(synk): for large graphs replace the dense O(N^2) A_norm with a CSR
# scalar-prefetch + manual-DMA gather/segment-sum aggregation kernel.


# ---------------------------------------------------------------------------
# Parameter init (mirrors GNNNet.__init__ shapes; PReLU alpha init 0.25)
# ---------------------------------------------------------------------------
def init_params(key, layer_num, conv_dim, feature_num, dnn_dim):
    keys = jax.random.split(key, 2 * layer_num + 4)
    convs = []
    in_dim = feature_num
    for i in range(layer_num):
        w = jax.random.normal(keys[2 * i], (in_dim, conv_dim), jnp.float32) * 0.1
        b = jnp.zeros((conv_dim,), jnp.float32)
        alpha = jnp.float32(0.25)
        convs.append((w, b, alpha))
        in_dim = conv_dim
    w1 = jax.random.normal(keys[2 * layer_num], (conv_dim * 2, dnn_dim), jnp.float32) * 0.1
    b1 = jax.random.normal(keys[2 * layer_num + 1], (dnn_dim,), jnp.float32) * 0.01
    alpha1 = jnp.float32(0.25)
    w2 = jax.random.normal(keys[2 * layer_num + 2], (dnn_dim, 1), jnp.float32) * 0.1
    b2 = jax.random.normal(keys[2 * layer_num + 3], (1,), jnp.float32) * 0.01
    return {"convs": convs, "dnn": (w1, b1, alpha1, w2, b2)}


# ---------------------------------------------------------------------------
# One-time weight padding / bf16 casts (hoisted out of the forward pass)
# ---------------------------------------------------------------------------
def prepare_params(params, feature_num, conv_dim, dnn_dim):
    f_pad = _round_up(feature_num, LANE)
    c_pad = _round_up(conv_dim, LANE)
    d_pad = _round_up(dnn_dim, LANE)
    convs_p = []
    in_pad = f_pad
    for (w, b, alpha) in params["convs"]:
        w_p = _pad2d(w, in_pad, c_pad).astype(jnp.bfloat16)
        b_p = jnp.pad(b.astype(jnp.float32), (0, c_pad - b.shape[0])).reshape(1, c_pad)
        a_p = jnp.full((1, c_pad), alpha, jnp.float32)
        convs_p.append((w_p, b_p, a_p))
        in_pad = c_pad
    w1, b1, alpha1, w2, b2 = params["dnn"]
    w1a = _pad2d(w1[:conv_dim], c_pad, d_pad).astype(jnp.bfloat16)
    w1b = _pad2d(w1[conv_dim:], c_pad, d_pad).astype(jnp.bfloat16)
    b1_p = jnp.pad(b1.astype(jnp.float32), (0, d_pad - dnn_dim)).reshape(1, d_pad)
    a1_p = jnp.full((1, d_pad), alpha1, jnp.float32)
    w2_p = _pad2d(w2, d_pad, LANE).astype(jnp.bfloat16)
    b2_p = jnp.pad(b2.astype(jnp.float32), (0, LANE - 1)).reshape(1, LANE)
    return {"convs": convs_p, "dnn": (w1a, w1b, b1_p, a1_p, w2_p, b2_p)}


# ---------------------------------------------------------------------------
# Forward pass (mirrors GNNNet.forward); jit this whole function.
# ---------------------------------------------------------------------------
def gnn_net_forward(prepared, x, edge_index, edge_weight, label_edge_index):
    n, _ = x.shape
    n_pad = _round_up(n, LANE)                    # pad N only to the lane width
    f_pad = prepared["convs"][0][0].shape[0]

    a_norm = gcn_norm_dense(edge_index, edge_weight, n)
    a_pad = _pad2d(a_norm, n_pad, n_pad).astype(jnp.bfloat16)
    h = _pad2d(x, n_pad, f_pad).astype(jnp.bfloat16)

    for (w_p, b_p, alpha_p) in prepared["convs"]:
        h = gcn_layer_fused(a_pad, h, w_p, b_p, alpha_p)   # one Pallas kernel / layer

    # TODO(synk): fold this row gather into the head kernel via scalar-prefetched
    # indices (PrefetchScalarGridSpec + manual DMA gather) once E gets large.
    x1 = jnp.take(h, label_edge_index[0], axis=0)
    x2 = jnp.take(h, label_edge_index[1], axis=0)
    e = x1.shape[0]
    e_pad = _round_up(e, LANE)
    x1 = jnp.pad(x1, ((0, e_pad - e), (0, 0)))
    x2 = jnp.pad(x2, ((0, e_pad - e), (0, 0)))

    w1a, w1b, b1_p, a1_p, w2_p, b2_p = prepared["dnn"]
    out = dnn_head(x1, x2, w1a, w1b, b1_p, a1_p, w2_p, b2_p)  # Pallas kernel
    return out[:e, :1]


# ---------------------------------------------------------------------------
# Pure-JAX f32 reference (same math as the PyTorch module)
# ---------------------------------------------------------------------------
def gnn_net_reference(params, x, edge_index, edge_weight, label_edge_index):
    n = x.shape[0]
    a = gcn_norm_dense(edge_index, edge_weight, n)
    h = x.astype(jnp.float32)
    for (w, b, alpha) in params["convs"]:
        z = a @ (h @ w) + b
        h = jnp.where(z > 0, z, alpha * z)
    x1 = h[label_edge_index[0]]
    x2 = h[label_edge_index[1]]
    p = jnp.concatenate([x1, x2], axis=-1)
    w1, b1, alpha1, w2, b2 = params["dnn"]
    z = p @ w1 + b1
    z = jnp.where(z > 0, z, alpha1 * z)
    return z @ w2 + b2


if __name__ == "__main__":
    # small shapes consistent with the module's forward
    N = 200            # number of graph nodes (padded to 256 internally)
    FEATURE_NUM = 256  # input node feature dim
    CONV_DIM = 128
    DNN_DIM = 128
    LAYER_NUM = 2
    E = 512            # number of graph edges
    E_LABEL = 96       # number of label edges (pairs to score; padded to 128)

    key = jax.random.PRNGKey(0)
    k_x, k_src, k_tgt, k_w, k_l0, k_l1, k_params = jax.random.split(key, 7)

    x = jax.random.normal(k_x, (N, FEATURE_NUM), jnp.float32)
    edge_index = jnp.stack([
        jax.random.randint(k_src, (E,), 0, N),
        jax.random.randint(k_tgt, (E,), 0, N),
    ])
    edge_weight = jax.random.uniform(k_w, (E,), jnp.float32)
    label_edge_index = jnp.stack([
        jax.random.randint(k_l0, (E_LABEL,), 0, N),
        jax.random.randint(k_l1, (E_LABEL,), 0, N),
    ])

    params = init_params(k_params, LAYER_NUM, CONV_DIM, FEATURE_NUM, DNN_DIM)
    prepared = prepare_params(params, FEATURE_NUM, CONV_DIM, DNN_DIM)

    fwd = jax.jit(gnn_net_forward)
    out = fwd(prepared, x, edge_index, edge_weight, label_edge_index)
    out = jax.block_until_ready(out)
    assert out.shape == (E_LABEL, 1), out.shape
    assert out.dtype == jnp.float32
    assert bool(jnp.all(jnp.isfinite(out)))

    ref = gnn_net_reference(params, x, edge_index, edge_weight, label_edge_index)
    err = float(jnp.max(jnp.abs(out - ref)))
    assert err < 0.15, f"max abs err vs f32 reference: {err}"

    print("KERNEL_OK")
</pallas_src>

<mosaic_0001>
module attributes {stable_mosaic.version = 11 : i64} {
  func.func private @main(%arg0: i32) attributes {dimension_semantics = [#tpu.dimension_semantics<core_parallel>], iteration_bounds = array<i64: 2>, tpu.core_type = #tpu.core_type<sc_scalar_subcore>, window_params = []} {
    return
  }
}

module attributes {stable_mosaic.version = 11 : i64} {
  func.func private @main(%arg0: i32) attributes {dimension_semantics = [#tpu.dimension_semantics<core_parallel>], iteration_bounds = array<i64: 2>, tpu.core_type = #tpu.core_type<sc_scalar_subcore>, window_params = []} {
    return
  }
}

module attributes {stable_mosaic.version = 11 : i64} {
  func.func @_gcn_fused_kernel(%arg0: i32, %arg1: i32, %arg2: memref<128x256xbf16, #tpu.memory_space<vmem>>, %arg3: memref<256x128xbf16, #tpu.memory_space<vmem>>, %arg4: memref<128x128xbf16, #tpu.memory_space<vmem>>, %arg5: memref<1x128xf32, #tpu.memory_space<vmem>>, %arg6: memref<1x128xf32, #tpu.memory_space<vmem>>, %arg7: memref<128x128xbf16, #tpu.memory_space<vmem>>, %arg8: memref<128x128xf32, #tpu.memory_space<vmem>>) attributes {dimension_semantics = [#tpu.dimension_semantics<parallel>, #tpu.dimension_semantics<arbitrary>], iteration_bounds = array<i64: 2, 1>, scalar_prefetch = 0 : i64, scratch_operands = 1 : i64, tpu.core_type = #tpu.core_type<tc>, window_params = [{transform_indices = @transform_0, window_bounds = array<i64: 128, 256>}, {transform_indices = @transform_1, window_bounds = array<i64: 256, 128>}, {pipeline_mode = #tpu.pipeline_mode<synchronous>, transform_indices = @transform_2, window_bounds = array<i64: 128, 128>}, {pipeline_mode = #tpu.pipeline_mode<synchronous>, transform_indices = @transform_3, window_bounds = array<i64: 1, 128>}, {pipeline_mode = #tpu.pipeline_mode<synchronous>, transform_indices = @transform_4, window_bounds = array<i64: 1, 128>}, {transform_indices = @transform_5, window_bounds = array<i64: 128, 128>}]} {
    %c0_i32 = arith.constant 0 : i32
    %0 = arith.cmpi eq, %arg1, %c0_i32 : i32
    %1 = arith.extui %0 : i1 to i32
    %c0_i32_0 = arith.constant 0 : i32
    %2 = arith.cmpi ne, %1, %c0_i32_0 : i32
    scf.if %2 {
      %cst_13 = arith.constant 0.000000e+00 : f32
      %15 = vector.broadcast %cst_13 : f32 to vector<128x128xf32>
      %c0_14 = arith.constant 0 : index
      %c0_15 = arith.constant 0 : index
      %16 = vector.load %arg8[%c0_14, %c0_15] : memref<128x128xf32, #tpu.memory_space<vmem>>, vector<128x128xf32>
      tpu.vector_store %arg8[%c0_14, %c0_15], %15 {strides = array<i32>} : memref<128x128xf32, #tpu.memory_space<vmem>>, vector<128x128xf32>,
    } else {
    }
    %c0 = arith.constant 0 : index
    %c0_1 = arith.constant 0 : index
    %3 = vector.load %arg3[%c0, %c0_1] : memref<256x128xbf16, #tpu.memory_space<vmem>>, vector<256x128xbf16>
    %c0_2 = arith.constant 0 : index
    %c0_3 = arith.constant 0 : index
    %4 = vector.load %arg4[%c0_2, %c0_3] : memref<128x128xbf16, #tpu.memory_space<vmem>>, vector<128x128xbf16>
    %cst = arith.constant dense<0.000000e+00> : vector<256x128xf32>
    %5 = tpu.matmul %3, %4, %cst {dimension_numbers = #tpu.dot_dimension_numbers<[1], [0], [0], [1], [0, 0, 1, 1], [], []>} : vector<256x128xbf16>, vector<128x128xbf16>, vector<256x128xf32> -> vector<256x128xf32>
    %c0_4 = arith.constant 0 : index
    %c0_5 = arith.constant 0 : index
    %6 = vector.load %arg8[%c0_4, %c0_5] : memref<128x128xf32, #tpu.memory_space<vmem>>, vector<128x128xf32>
    %c0_6 = arith.constant 0 : index
    %c0_7 = arith.constant 0 : index
    %7 = vector.load %arg2[%c0_6, %c0_7] : memref<128x256xbf16, #tpu.memory_space<vmem>>, vector<128x256xbf16>
    %8 = arith.truncf %5 : vector<256x128xf32> to vector<256x128xbf16>
    %cst_8 = arith.constant dense<0.000000e+00> : vector<128x128xf32>
    %9 = tpu.matmul %7, %8, %cst_8 {dimension_numbers = #tpu.dot_dimension_numbers<[1], [0], [0], [1], [0, 0, 1, 1], [], []>} : vector<128x256xbf16>, vector<256x128xbf16>, vector<128x128xf32> -> vector<128x128xf32>
    %10 = arith.addf %6, %9 : vector<128x128xf32>
    %c0_9 = arith.constant 0 : index
    %c0_10 = arith.constant 0 : index
    %11 = vector.load %arg8[%c0_9, %c0_10] : memref<128x128xf32, #tpu.memory_space<vmem>>, vector<128x128xf32>
    tpu.vector_store %arg8[%c0_9, %c0_10], %10 {strides = array<i32>} : memref<128x128xf32, #tpu.memory_space<vmem>>, vector<128x128xf32>,
    %c0_i32_11 = arith.constant 0 : i32
    %12 = arith.cmpi eq, %arg1, %c0_i32_11 : i32
    %13 = arith.extui %12 : i1 to i32
    %c0_i32_12 = arith.constant 0 : i32
    %14 = arith.cmpi ne, %13, %c0_i32_12 : i32
    scf.if %14 {
      %c0_13 = arith.constant 0 : index
      %c0_14 = arith.constant 0 : index
      %15 = vector.load %arg8[%c0_13, %c0_14] : memref<128x128xf32, #tpu.memory_space<vmem>>, vector<128x128xf32>
      %c0_15 = arith.constant 0 : index
      %c0_16 = arith.constant 0 : index
      %16 = vector.load %arg5[%c0_15, %c0_16] : memref<1x128xf32, #tpu.memory_space<vmem>>, vector<1x128xf32>
      %17 = vector.broadcast %16 : vector<1x128xf32> to vector<128x128xf32>
      %18 = arith.addf %15, %17 : vector<128x128xf32>
      %cst_17 = arith.constant 0.000000e+00 : f32
      %19 = vector.broadcast %cst_17 : f32 to vector<128x128xf32>
      %20 = arith.cmpf ogt, %18, %19 : vector<128x128xf32>
      %c0_18 = arith.constant 0 : index
      %c0_19 = arith.constant 0 : index
      %21 = vector.load %arg6[%c0_18, %c0_19] : memref<1x128xf32, #tpu.memory_space<vmem>>, vector<1x128xf32>
      %22 = vector.broadcast %21 : vector<1x128xf32> to vector<128x128xf32>
      %23 = arith.mulf %22, %18 : vector<128x128xf32>
      %24 = arith.select %20, %18, %23 : vector<128x128xi1>, vector<128x128xf32>
      %25 = arith.truncf %24 : vector<128x128xf32> to vector<128x128xbf16>
      %c0_20 = arith.constant 0 : index
      %c0_21 = arith.constant 0 : index
      %26 = vector.load %arg7[%c0_20, %c0_21] : memref<128x128xbf16, #tpu.memory_space<vmem>>, vector<128x128xbf16>
      tpu.vector_store %arg7[%c0_20, %c0_21], %25 {strides = array<i32>} : memref<128x128xbf16, #tpu.memory_space<vmem>>, vector<128x128xbf16>,
    } else {
    }
    return
  }
  func.func @transform_0(%arg0: i32, %arg1: i32) -> (i32, i32) {
    %c0_i32 = arith.constant 0 : i32
    return %arg0, %arg1 : i32, i32
  }
  func.func @transform_1(%arg0: i32, %arg1: i32) -> (i32, i32) {
    %c0_i32 = arith.constant 0 : i32
    %c0_i32_0 = arith.constant 0 : i32
    return %arg1, %c0_i32 : i32, i32
  }
  func.func @transform_2(%arg0: i32, %arg1: i32) -> (i32, i32) {
    %c0_i32 = arith.constant 0 : i32
    %c0_i32_0 = arith.constant 0 : i32
    %c0_i32_1 = arith.constant 0 : i32
    return %c0_i32, %c0_i32_0 : i32, i32
  }
  func.func @transform_3(%arg0: i32, %arg1: i32) -> (i32, i32) {
    %c0_i32 = arith.constant 0 : i32
    %c0_i32_0 = arith.constant 0 : i32
    %c0_i32_1 = arith.constant 0 : i32
    return %c0_i32, %c0_i32_0 : i32, i32
  }
  func.func @transform_4(%arg0: i32, %arg1: i32) -> (i32, i32) {
    %c0_i32 = arith.constant 0 : i32
    %c0_i32_0 = arith.constant 0 : i32
    %c0_i32_1 = arith.constant 0 : i32
    return %c0_i32, %c0_i32_0 : i32, i32
  }
  func.func @transform_5(%arg0: i32, %arg1: i32) -> (i32, i32) {
    %c0_i32 = arith.constant 0 : i32
    %c0_i32_0 = arith.constant 0 : i32
    return %arg0, %c0_i32 : i32, i32
  }
}

module attributes {stable_mosaic.version = 11 : i64} {
  func.func @_gcn_fused_kernel(%arg0: i32, %arg1: i32, %arg2: memref<128x256xbf16, #tpu.memory_space<vmem>>, %arg3: memref<256x256xbf16, #tpu.memory_space<vmem>>, %arg4: memref<256x128xbf16, #tpu.memory_space<vmem>>, %arg5: memref<1x128xf32, #tpu.memory_space<vmem>>, %arg6: memref<1x128xf32, #tpu.memory_space<vmem>>, %arg7: memref<128x128xbf16, #tpu.memory_space<vmem>>, %arg8: memref<128x128xf32, #tpu.memory_space<vmem>>) attributes {dimension_semantics = [#tpu.dimension_semantics<parallel>, #tpu.dimension_semantics<arbitrary>], iteration_bounds = array<i64: 2, 1>, scalar_prefetch = 0 : i64, scratch_operands = 1 : i64, tpu.core_type = #tpu.core_type<tc>, window_params = [{transform_indices = @transform_0, window_bounds = array<i64: 128, 256>}, {transform_indices = @transform_1, window_bounds = array<i64: 256, 256>}, {pipeline_mode = #tpu.pipeline_mode<synchronous>, transform_indices = @transform_2, window_bounds = array<i64: 256, 128>}, {pipeline_mode = #tpu.pipeline_mode<synchronous>, transform_indices = @transform_3, window_bounds = array<i64: 1, 128>}, {pipeline_mode = #tpu.pipeline_mode<synchronous>, transform_indices = @transform_4, window_bounds = array<i64: 1, 128>}, {transform_indices = @transform_5, window_bounds = array<i64: 128, 128>}]} {
    %c0_i32 = arith.constant 0 : i32
    %0 = arith.cmpi eq, %arg1, %c0_i32 : i32
    %1 = arith.extui %0 : i1 to i32
    %c0_i32_0 = arith.constant 0 : i32
    %2 = arith.cmpi ne, %1, %c0_i32_0 : i32
    scf.if %2 {
      %cst_13 = arith.constant 0.000000e+00 : f32
      %15 = vector.broadcast %cst_13 : f32 to vector<128x128xf32>
      %c0_14 = arith.constant 0 : index
      %c0_15 = arith.constant 0 : index
      %16 = vector.load %arg8[%c0_14, %c0_15] : memref<128x128xf32, #tpu.memory_space<vmem>>, vector<128x128xf32>
      tpu.vector_store %arg8[%c0_14, %c0_15], %15 {strides = array<i32>} : memref<128x128xf32, #tpu.memory_space<vmem>>, vector<128x128xf32>,
    } else {
    }
    %c0 = arith.constant 0 : index
    %c0_1 = arith.constant 0 : index
    %3 = vector.load %arg3[%c0, %c0_1] : memref<256x256xbf16, #tpu.memory_space<vmem>>, vector<256x256xbf16>
    %c0_2 = arith.constant 0 : index
    %c0_3 = arith.constant 0 : index
    %4 = vector.load %arg4[%c0_2, %c0_3] : memref<256x128xbf16, #tpu.memory_space<vmem>>, vector<256x128xbf16>
    %cst = arith.constant dense<0.000000e+00> : vector<256x128xf32>
    %5 = tpu.matmul %3, %4, %cst {dimension_numbers = #tpu.dot_dimension_numbers<[1], [0], [0], [1], [0, 0, 1, 1], [], []>} : vector<256x256xbf16>, vector<256x128xbf16>, vector<256x128xf32> -> vector<256x128xf32>
    %c0_4 = arith.constant 0 : index
    %c0_5 = arith.constant 0 : index
    %6 = vector.load %arg8[%c0_4, %c0_5] : memref<128x128xf32, #tpu.memory_space<vmem>>, vector<128x128xf32>
    %c0_6 = arith.constant 0 : index
    %c0_7 = arith.constant 0 : index
    %7 = vector.load %arg2[%c0_6, %c0_7] : memref<128x256xbf16, #tpu.memory_space<vmem>>, vector<128x256xbf16>
    %8 = arith.truncf %5 : vector<256x128xf32> to vector<256x128xbf16>
    %cst_8 = arith.constant dense<0.000000e+00> : vector<128x128xf32>
    %9 = tpu.matmul %7, %8, %cst_8 {dimension_numbers = #tpu.dot_dimension_numbers<[1], [0], [0], [1], [0, 0, 1, 1], [], []>} : vector<128x256xbf16>, vector<256x128xbf16>, vector<128x128xf32> -> vector<128x128xf32>
    %10 = arith.addf %6, %9 : vector<128x128xf32>
    %c0_9 = arith.constant 0 : index
    %c0_10 = arith.constant 0 : index
    %11 = vector.load %arg8[%c0_9, %c0_10] : memref<128x128xf32, #tpu.memory_space<vmem>>, vector<128x128xf32>
    tpu.vector_store %arg8[%c0_9, %c0_10], %10 {strides = array<i32>} : memref<128x128xf32, #tpu.memory_space<vmem>>, vector<128x128xf32>,
    %c0_i32_11 = arith.constant 0 : i32
    %12 = arith.cmpi eq, %arg1, %c0_i32_11 : i32
    %13 = arith.extui %12 : i1 to i32
    %c0_i32_12 = arith.constant 0 : i32
    %14 = arith.cmpi ne, %13, %c0_i32_12 : i32
    scf.if %14 {
      %c0_13 = arith.constant 0 : index
      %c0_14 = arith.constant 0 : index
      %15 = vector.load %arg8[%c0_13, %c0_14] : memref<128x128xf32, #tpu.memory_space<vmem>>, vector<128x128xf32>
      %c0_15 = arith.constant 0 : index
      %c0_16 = arith.constant 0 : index
      %16 = vector.load %arg5[%c0_15, %c0_16] : memref<1x128xf32, #tpu.memory_space<vmem>>, vector<1x128xf32>
      %17 = vector.broadcast %16 : vector<1x128xf32> to vector<128x128xf32>
      %18 = arith.addf %15, %17 : vector<128x128xf32>
      %cst_17 = arith.constant 0.000000e+00 : f32
      %19 = vector.broadcast %cst_17 : f32 to vector<128x128xf32>
      %20 = arith.cmpf ogt, %18, %19 : vector<128x128xf32>
      %c0_18 = arith.constant 0 : index
      %c0_19 = arith.constant 0 : index
      %21 = vector.load %arg6[%c0_18, %c0_19] : memref<1x128xf32, #tpu.memory_space<vmem>>, vector<1x128xf32>
      %22 = vector.broadcast %21 : vector<1x128xf32> to vector<128x128xf32>
      %23 = arith.mulf %22, %18 : vector<128x128xf32>
      %24 = arith.select %20, %18, %23 : vector<128x128xi1>, vector<128x128xf32>
      %25 = arith.truncf %24 : vector<128x128xf32> to vector<128x128xbf16>
      %c0_20 = arith.constant 0 : index
      %c0_21 = arith.constant 0 : index
      %26 = vector.load %arg7[%c0_20, %c0_21] : memref<128x128xbf16, #tpu.memory_space<vmem>>, vector<128x128xbf16>
      tpu.vector_store %arg7[%c0_20, %c0_21], %25 {strides = array<i32>} : memref<128x128xbf16, #tpu.memory_space<vmem>>, vector<128x128xbf16>,
    } else {
    }
    return
  }
  func.func @transform_0(%arg0: i32, %arg1: i32) -> (i32, i32) {
    %c0_i32 = arith.constant 0 : i32
    return %arg0, %arg1 : i32, i32
  }
  func.func @transform_1(%arg0: i32, %arg1: i32) -> (i32, i32) {
    %c0_i32 = arith.constant 0 : i32
    %c0_i32_0 = arith.constant 0 : i32
    return %arg1, %c0_i32 : i32, i32
  }
  func.func @transform_2(%arg0: i32, %arg1: i32) -> (i32, i32) {
    %c0_i32 = arith.constant 0 : i32
    %c0_i32_0 = arith.constant 0 : i32
    %c0_i32_1 = arith.constant 0 : i32
    return %c0_i32, %c0_i32_0 : i32, i32
  }
  func.func @transform_3(%arg0: i32, %arg1: i32) -> (i32, i32) {
    %c0_i32 = arith.constant 0 : i32
    %c0_i32_0 = arith.constant 0 : i32
    %c0_i32_1 = arith.constant 0 : i32
    return %c0_i32, %c0_i32_0 : i32, i32
  }
  func.func @transform_4(%arg0: i32, %arg1: i32) -> (i32, i32) {
    %c0_i32 = arith.constant 0 : i32
    %c0_i32_0 = arith.constant 0 : i32
    %c0_i32_1 = arith.constant 0 : i32
    return %c0_i32, %c0_i32_0 : i32, i32
  }
  func.func @transform_5(%arg0: i32, %arg1: i32) -> (i32, i32) {
    %c0_i32 = arith.constant 0 : i32
    %c0_i32_0 = arith.constant 0 : i32
    return %arg0, %c0_i32 : i32, i32
  }
}

module attributes {stable_mosaic.version = 11 : i64} {
  func.func @_dnn_head_kernel(%arg0: i32, %arg1: memref<128x128xbf16, #tpu.memory_space<vmem>>, %arg2: memref<128x128xbf16, #tpu.memory_space<vmem>>, %arg3: memref<128x128xbf16, #tpu.memory_space<vmem>>, %arg4: memref<128x128xbf16, #tpu.memory_space<vmem>>, %arg5: memref<1x128xf32, #tpu.memory_space<vmem>>, %arg6: memref<1x128xf32, #tpu.memory_space<vmem>>, %arg7: memref<128x128xbf16, #tpu.memory_space<vmem>>, %arg8: memref<1x128xf32, #tpu.memory_space<vmem>>, %arg9: memref<128x128xf32, #tpu.memory_space<vmem>>) attributes {dimension_semantics = [#tpu.dimension_semantics<parallel>], iteration_bounds = array<i64: 1>, scalar_prefetch = 0 : i64, scratch_operands = 0 : i64, tpu.core_type = #tpu.core_type<tc>, window_params = [{transform_indices = @transform_0, window_bounds = array<i64: 128, 128>}, {transform_indices = @transform_1, window_bounds = array<i64: 128, 128>}, {pipeline_mode = #tpu.pipeline_mode<synchronous>, transform_indices = @transform_2, window_bounds = array<i64: 128, 128>}, {pipeline_mode = #tpu.pipeline_mode<synchronous>, transform_indices = @transform_3, window_bounds = array<i64: 128, 128>}, {pipeline_mode = #tpu.pipeline_mode<synchronous>, transform_indices = @transform_4, window_bounds = array<i64: 1, 128>}, {pipeline_mode = #tpu.pipeline_mode<synchronous>, transform_indices = @transform_5, window_bounds = array<i64: 1, 128>}, {pipeline_mode = #tpu.pipeline_mode<synchronous>, transform_indices = @transform_6, window_bounds = array<i64: 128, 128>}, {pipeline_mode = #tpu.pipeline_mode<synchronous>, transform_indices = @transform_7, window_bounds = array<i64: 1, 128>}, {transform_indices = @transform_8, window_bounds = array<i64: 128, 128>}]} {
    %c0 = arith.constant 0 : index
    %c0_0 = arith.constant 0 : index
    %0 = vector.load %arg1[%c0, %c0_0] : memref<128x128xbf16, #tpu.memory_space<vmem>>, vector<128x128xbf16>
    %c0_1 = arith.constant 0 : index
    %c0_2 = arith.constant 0 : index
    %1 = vector.load %arg3[%c0_1, %c0_2] : memref<128x128xbf16, #tpu.memory_space<vmem>>, vector<128x128xbf16>
    %cst = arith.constant dense<0.000000e+00> : vector<128x128xf32>
    %2 = tpu.matmul %0, %1, %cst {dimension_numbers = #tpu.dot_dimension_numbers<[1], [0], [0], [1], [0, 0, 1, 1], [], []>} : vector<128x128xbf16>, vector<128x128xbf16>, vector<128x128xf32> -> vector<128x128xf32>
    %c0_3 = arith.constant 0 : index
    %c0_4 = arith.constant 0 : index
    %3 = vector.load %arg2[%c0_3, %c0_4] : memref<128x128xbf16, #tpu.memory_space<vmem>>, vector<128x128xbf16>
    %c0_5 = arith.constant 0 : index
    %c0_6 = arith.constant 0 : index
    %4 = vector.load %arg4[%c0_5, %c0_6] : memref<128x128xbf16, #tpu.memory_space<vmem>>, vector<128x128xbf16>
    %cst_7 = arith.constant dense<0.000000e+00> : vector<128x128xf32>
    %5 = tpu.matmul %3, %4, %cst_7 {dimension_numbers = #tpu.dot_dimension_numbers<[1], [0], [0], [1], [0, 0, 1, 1], [], []>} : vector<128x128xbf16>, vector<128x128xbf16>, vector<128x128xf32> -> vector<128x128xf32>
    %6 = arith.addf %2, %5 : vector<128x128xf32>
    %c0_8 = arith.constant 0 : index
    %c0_9 = arith.constant 0 : index
    %7 = vector.load %arg5[%c0_8, %c0_9] : memref<1x128xf32, #tpu.memory_space<vmem>>, vector<1x128xf32>
    %8 = vector.broadcast %7 : vector<1x128xf32> to vector<128x128xf32>
    %9 = arith.addf %6, %8 : vector<128x128xf32>
    %cst_10 = arith.constant 0.000000e+00 : f32
    %10 = vector.broadcast %cst_10 : f32 to vector<128x128xf32>
    %11 = arith.cmpf ogt, %9, %10 : vector<128x128xf32>
    %c0_11 = arith.constant 0 : index
    %c0_12 = arith.constant 0 : index
    %12 = vector.load %arg6[%c0_11, %c0_12] : memref<1x128xf32, #tpu.memory_space<vmem>>, vector<1x128xf32>
    %13 = vector.broadcast %12 : vector<1x128xf32> to vector<128x128xf32>
    %14 = arith.mulf %13, %9 : vector<128x128xf32>
    %15 = arith.select %11, %9, %14 : vector<128x128xi1>, vector<128x128xf32>
    %16 = arith.truncf %15 : vector<128x128xf32> to vector<128x128xbf16>
    %c0_13 = arith.constant 0 : index
    %c0_14 = arith.constant 0 : index
    %17 = vector.load %arg7[%c0_13, %c0_14] : memref<128x128xbf16, #tpu.memory_space<vmem>>, vector<128x128xbf16>
    %cst_15 = arith.constant dense<0.000000e+00> : vector<128x128xf32>
    %18 = tpu.matmul %16, %17, %cst_15 {dimension_numbers = #tpu.dot_dimension_numbers<[1], [0], [0], [1], [0, 0, 1, 1], [], []>} : vector<128x128xbf16>, vector<128x128xbf16>, vector<128x128xf32> -> vector<128x128xf32>
    %c0_16 = arith.constant 0 : index
    %c0_17 = arith.constant 0 : index
    %19 = vector.load %arg8[%c0_16, %c0_17] : memref<1x128xf32, #tpu.memory_space<vmem>>, vector<1x128xf32>
    %20 = vector.broadcast %19 : vector<1x128xf32> to vector<128x128xf32>
    %21 = arith.addf %18, %20 : vector<128x128xf32>
    %c0_18 = arith.constant 0 : index
    %c0_19 = arith.constant 0 : index
    %22 = vector.load %arg9[%c0_18, %c0_19] : memref<128x128xf32, #tpu.memory_space<vmem>>, vector<128x128xf32>
    tpu.vector_store %arg9[%c0_18, %c0_19], %21 {strides = array<i32>} : memref<128x128xf32, #tpu.memory_space<vmem>>, vector<128x128xf32>,
    return
  }
  func.func @transform_0(%arg0: i32) -> (i32, i32) {
    %c0_i32 = arith.constant 0 : i32
    %c0_i32_0 = arith.constant 0 : i32
    return %arg0, %c0_i32 : i32, i32
  }
  func.func @transform_1(%arg0: i32) -> (i32, i32) {
    %c0_i32 = arith.constant 0 : i32
    %c0_i32_0 = arith.constant 0 : i32
    return %arg0, %c0_i32 : i32, i32
  }
  func.func @transform_2(%arg0: i32) -> (i32, i32) {
    %c0_i32 = arith.constant 0 : i32
    %c0_i32_0 = arith.constant 0 : i32
    %c0_i32_1 = arith.constant 0 : i32
    return %c0_i32, %c0_i32_0 : i32, i32
  }
  func.func @transform_3(%arg0: i32) -> (i32, i32) {
    %c0_i32 = arith.constant 0 : i32
    %c0_i32_0 = arith.constant 0 : i32
    %c0_i32_1 = arith.constant 0 : i32
    return %c0_i32, %c0_i32_0 : i32, i32
  }
  func.func @transform_4(%arg0: i32) -> (i32, i32) {
    %c0_i32 = arith.constant 0 : i32
    %c0_i32_0 = arith.constant 0 : i32
    %c0_i32_1 = arith.constant 0 : i32
    return %c0_i32, %c0_i32_0 : i32, i32
  }
  func.func @transform_5(%arg0: i32) -> (i32, i32) {
    %c0_i32 = arith.constant 0 : i32
    %c0_i32_0 = arith.constant 0 : i32
    %c0_i32_1 = arith.constant 0 : i32
    return %c0_i32, %c0_i32_0 : i32, i32
  }
  func.func @transform_6(%arg0: i32) -> (i32, i32) {
    %c0_i32 = arith.constant 0 : i32
    %c0_i32_0 = arith.constant 0 : i32
    %c0_i32_1 = arith.constant 0 : i32
    return %c0_i32, %c0_i32_0 : i32, i32
  }
  func.func @transform_7(%arg0: i32) -> (i32, i32) {
    %c0_i32 = arith.constant 0 : i32
    %c0_i32_0 = arith.constant 0 : i32
    %c0_i32_1 = arith.constant 0 : i32
    return %c0_i32, %c0_i32_0 : i32, i32
  }
  func.func @transform_8(%arg0: i32) -> (i32, i32) {
    %c0_i32 = arith.constant 0 : i32
    %c0_i32_0 = arith.constant 0 : i32
    return %arg0, %c0_i32 : i32, i32
  }
}

</mosaic_0001>

<bundles_post_ra>
// kernel: gnn_net_forward.4
= control target key start
LH: loop header
LB: loop body
LE: loop exit
PB: predicated region body
PF: predicated region fallthrough
CT: control target
= control target key end

     0   :  { %s1572_s18 = smov 0   ;;  %s1574_s19 = smov 0   ;;  %s1754_s0 = inlined_call_operand.vmem [shape: bf16[256,256], index: 0, kind: input, shape index: {}]   ;;  %s1755_s1 = inlined_call_operand.vmem [shape: bf16[256,128], index: 1, kind: input, shape index: {}]   ;;  %s1756_s2 = inlined_call_operand.vmem [shape: bf16[128,128], index: 2, kind: input, shape index: {}]   ;;  %s1757_s3 = inlined_call_operand.vmem [shape: f32[1,128], index: 3, kind: input, shape index: {}]   ;;  %s1758_s4 = inlined_call_operand.vmem [shape: f32[1,128], index: 4, kind: input, shape index: {}]   ;;  %s1759_s5 = inlined_call_operand.vmem [shape: bf16[256,128], index: 5, kind: output, shape index: {}]  }
   0x1   :  { %s1576_s20 = smov 0  }
   0x2 LB: > { %s27_s21 = sadd.s32 1, %s1536_s19  ;;  %p1180_p0 = scmp.ge.s32.totalorder %s1540_s20, 1  ;;  %s1540_s20 = sphi %s1576_s20, %s15_s20   ;;  %s1536_s19 = sphi %s1574_s19, %s1761_s19   ;;  %s1532_s18 = sphi %s1572_s18, %s1760_s18  }
   0x3   : > { %p29_p1 = scmp.ge.s32.totalorder %s27_s21, 2  ;;  %p219_p2 = scmp.lt.s32.totalorder %s1540_s20, 3 }
   0x5   : > { %s1763_s21 = smov (%p29_p1, %s27_s21), 0  ;;  %p220_p3 = pnand %p1180_p0, %p219_p2 }
   0x6   : > { %v1470_v0 = vld [vmem:[%s1756_s2] sm:$0xff] (!%p220_p3)   ;;  %v1471_v1 = vld [vmem:[%s1756_s2 + $0x8] sm:$0xff] (!%p220_p3)   ;;  %v1472_v2 = vld [vmem:[%s1756_s2 + $0x10] sm:$0xff] (!%p220_p3)   ;;  %s1181_s28 = sshll.u32 (!%p220_p3), %s1532_s18, 4 }
   0x7   : > { %223 = sbr.rel (%p220_p3) target bundleno = 601 (0x259), region = 40  ;;  %1398 = vmatprep.subr.bf16.mxu0 (!%p220_p3), %v1470_v0  ;;  %v1473_v3 = vld [vmem:[%s1756_s2 + $0x18] sm:$0xff] (!%p220_p3)   ;;  %v1478_v4 = vld [vmem:[%s1755_s1] sm:$0xff] (!%p220_p3)   ;;  %v1475_v6 = vld [vmem:[%s1756_s2 + $0x28] sm:$0xff] (!%p220_p3)   ;;  %p259_p4 = scmp.lt.s32.totalorder (!%p220_p3), %s1181_s28, 31 }
   0x8   : > { %1399 = vmatpush3.bf16.msra.mxu0 (!%p220_p3), %v1470_v0  ;;  %1414 = vmatprep.mubr.bf16.mxu0 (!%p220_p3), %v1478_v4  ;;  %v1474_v5 = vld [vmem:[%s1756_s2 + $0x20] sm:$0xff] (!%p220_p3)   ;;  %v1476_v7 = vld [vmem:[%s1756_s2 + $0x30] sm:$0xff] (!%p220_p3)   ;;  %v1477_v8 = vld [vmem:[%s1756_s2 + $0x38] sm:$0xff] (!%p220_p3)  }
   0x9   : > { %1400 = vmatprep.subr.bf16.mxu0 (!%p220_p3), %v1471_v1  ;;  %v1479_v9 = vld [vmem:[%s1755_s1 + $0x8] sm:$0xff] (!%p220_p3)   ;;  %v1480_v10 = vld [vmem:[%s1755_s1 + $0x10] sm:$0xff] (!%p220_p3)   ;;  %v1481_v11 = vld [vmem:[%s1755_s1 + $0x18] sm:$0xff] (!%p220_p3)  }
   0xa   : > { %v1482_v12 = vld [vmem:[%s1755_s1 + $0x20] sm:$0xff] (!%p220_p3)   ;;  %v1483_v13 = vld [vmem:[%s1755_s1 + $0x28] sm:$0xff] (!%p220_p3)   ;;  %v1484_v14 = vld [vmem:[%s1755_s1 + $0x30] sm:$0xff] (!%p220_p3)  }
   0xb   : > { %v1485_v15 = vld [vmem:[%s1755_s1 + $0x38] sm:$0xff] (!%p220_p3)   ;;  %v1486_v16 = vld [vmem:[%s1755_s1 + $0x40] sm:$0xff] (!%p220_p3)   ;;  %v1487_v17 = vld [vmem:[%s1755_s1 + $0x48] sm:$0xff] (!%p220_p3)  }
   0xc   : > { %1401 = vmatpush3.bf16.msra.mxu0 (!%p220_p3), %v1471_v1  ;;  %v1488_v18 = vld [vmem:[%s1755_s1 + $0x50] sm:$0xff] (!%p220_p3)   ;;  %v1489_v19 = vld [vmem:[%s1755_s1 + $0x58] sm:$0xff] (!%p220_p3)   ;;  %v1490_v20 = vld [vmem:[%s1755_s1 + $0x60] sm:$0xff] (!%p220_p3)  }
   0xd   : > { %1402 = vmatprep.subr.bf16.mxu0 (!%p220_p3), %v1472_v2  ;;  %v1491_v21 = vld [vmem:[%s1755_s1 + $0x68] sm:$0xff] (!%p220_p3)   ;;  %v1492_v22 = vld [vmem:[%s1755_s1 + $0x70] sm:$0xff] (!%p220_p3)   ;;  %v1493_v23 = vld [vmem:[%s1755_s1 + $0x78] sm:$0xff] (!%p220_p3)  }
   0xe   : > { %s1765_s28 = smov (!%p259_p4, %s1181_s28), 31 }
   0xf   : > { %s1246_s29 = sshll.u32 %s1765_s28, 3  ;;  %s1185_s11 = sshll.u32 %s1765_s28, 2 }
  0x10   : > { %1403 = vmatpush3.bf16.msra.mxu0 %v1472_v2  ;;  %s1671_s7 = scalar_lea.vmem %s1754_s0, %s1246_s29  ;;  %s1707_s14 = scalar_lea.vmem %s1759_s5, %s1185_s11 }
  0x11   : > { %1404 = vmatprep.subr.bf16.mxu0 %v1473_v3  ;;  %v1496_v24 = vld [vmem:[%s1671_s7 + $0x4] ss:$8 sps:$4 sm:$0xff]  }
  0x12   : > { %815 = vmatprep.mubr.bf16.mxu1 %v1496_v24 }
  0x14   : > { %1405 = vmatpush3.bf16.msra.mxu0 %v1473_v3 }
  0x15   : > { %1406 = vmatprep.subr.bf16.mxu0 %v1474_v5 }
  0x18   : > { %1407 = vmatpush3.bf16.msra.mxu0 %v1474_v5 }
  0x19   : > { %1408 = vmatprep.subr.bf16.mxu0 %v1475_v6 }
  0x1c   : > { %1409 = vmatpush3.bf16.msra.mxu0 %v1475_v6 }
  0x1d   : > { %1410 = vmatprep.subr.bf16.mxu0 %v1476_v7 }
  0x20   : > { %1411 = vmatpush3.bf16.msra.mxu0 %v1476_v7 }
  0x21   : > { %1412 = vmatprep.subr.bf16.mxu0 %v1477_v8 }
  0x24   : > { %1413 = vmatpush3.bf16.msra.mxu0 %v1477_v8 }
  0x27   : > { %1415 = vmatmul.mubr.bf16.vlgmr.msra.gmra.mrb[0].mxu0 %v1479_v9  ;;  %v1494_v9 = vld [vmem:[%s1671_s7] ss:$8 sps:$4 sm:$0xff]  }
  0x28   : > { %1418 = vmatprep.mubr.bf16.mxu0 %v1480_v10  ;;  %v1497_v10 = vld [vmem:[%s1671_s7 + $0x14] ss:$8 sps:$4 sm:$0xff]  }
  0x2f   : > { %1419 = vmatmul.mubr.bf16.gmra.mrb[4].mxu0 %v1481_v11  ;;  %v1499_v11 = vld [vmem:[%s1671_s7 + $0x10] ss:$8 sps:$4 sm:$0xff]  }
  0x30   : > { %1422 = vmatprep.mubr.bf16.mxu0 %v1482_v12  ;;  %v1500_v12 = vld [vmem:[%s1671_s7 + $0x24] ss:$8 sps:$4 sm:$0xff]  }
  0x37   : > { %1423 = vmatmul.mubr.bf16.gmra.mrb[8].mxu0 %v1483_v13  ;;  %v1502_v13 = vld [vmem:[%s1671_s7 + $0x20] ss:$8 sps:$4 sm:$0xff]  }
  0x38   : > { %1426 = vmatprep.mubr.bf16.mxu0 %v1484_v14  ;;  %v1503_v14 = vld [vmem:[%s1671_s7 + $0x34] ss:$8 sps:$4 sm:$0xff]  }
  0x3f   : > { %1427 = vmatmul.mubr.bf16.gmra.mrb[12].mxu0 %v1485_v15  ;;  %v1505_v15 = vld [vmem:[%s1671_s7 + $0x30] ss:$8 sps:$4 sm:$0xff]  }
  0x40   : > { %1430 = vmatprep.mubr.bf16.mxu0 %v1486_v16  ;;  %v1506_v16 = vld [vmem:[%s1671_s7 + $0x44] ss:$8 sps:$4 sm:$0xff]  }
  0x47   : > { %1431 = vmatmul.mubr.bf16.gmra.mrb[16].mxu0 %v1487_v17  ;;  %v1508_v17 = vld [vmem:[%s1671_s7 + $0x40] ss:$8 sps:$4 sm:$0xff]  }
  0x48   : > { %1434 = vmatprep.mubr.bf16.mxu0 %v1488_v18  ;;  %v1509_v18 = vld [vmem:[%s1671_s7 + $0x54] ss:$8 sps:$4 sm:$0xff]  }
  0x4f   : > { %1435 = vmatmul.mubr.bf16.gmra.mrb[20].mxu0 %v1489_v19  ;;  %v1511_v19 = vld [vmem:[%s1671_s7 + $0x50] ss:$8 sps:$4 sm:$0xff]  }
  0x50   : > { %1438 = vmatprep.mubr.bf16.mxu0 %v1490_v20  ;;  %v1512_v20 = vld [vmem:[%s1671_s7 + $0x64] ss:$8 sps:$4 sm:$0xff]  }
  0x57   : > { %1439 = vmatmul.mubr.bf16.gmra.mrb[24].mxu0 %v1491_v21  ;;  %v1514_v21 = vld [vmem:[%s1671_s7 + $0x60] ss:$8 sps:$4 sm:$0xff]  }
  0x58   : > { %1442 = vmatprep.mubr.bf16.mxu0 %v1492_v22  ;;  %v1515_v22 = vld [vmem:[%s1671_s7 + $0x74] ss:$8 sps:$4 sm:$0xff]  }
  0x5f   : > { %1443 = vmatmul.mubr.bf16.gmra.mrb[28].mxu0 %v1493_v23  ;;  %v1517_v23 = vld [vmem:[%s1671_s7 + $0x70] ss:$8 sps:$4 sm:$0xff]  }
  0xfa   : > { %v1416_v25 = vpop.f32.mrb[0].mxu0 }
  0xfb   : > { %v528_v26 = vpop.f32.mrb[1].mxu0 }
  0xfc   : > { %v1417_v27 = vpop.f32.mrb[2].mxu0 }
  0xfd   : > { %v688_v28 = vpack.c.bf16 %v1417_v27, %v1416_v25  ;;  %v531_v29 = vpop.f32.mrb[3].mxu0 }
  0xfe   : > { %v687_v30 = vpack.c.bf16 %v531_v29, %v528_v26  ;;  %v1692_v26 = vld [vmem:[%s1757_s3] ss:$0 sm:$0xff] }
  0xff   : > { %v1697_v29 = vld [vmem:[%s1758_s4] ss:$0 sm:$0xff] }
 0x102   : > { %v1420_v31 = vpop.f32.mrb[4].mxu0 }
 0x103   : > { %v544_v32 = vpop.f32.mrb[5].mxu0 }
 0x104   : > { %v1421_v33 = vpop.f32.mrb[6].mxu0 }
 0x105   : > { %v690_v34 = vpack.c.bf16 %v1421_v33, %v1420_v31  ;;  %v547_v35 = vpop.f32.mrb[7].mxu0 }
 0x106   : > { %v689_v36 = vpack.c.bf16 %v547_v35, %v544_v32 }
 0x10a   : > { %v1424_v37 = vpop.f32.mrb[8].mxu0 }
 0x10b   : > { %v560_v38 = vpop.f32.mrb[9].mxu0 }
 0x10c   : > { %v1425_v39 = vpop.f32.mrb[10].mxu0 }
 0x10d   : > { %v692_v40 = vpack.c.bf16 %v1425_v39, %v1424_v37  ;;  %v563_v41 = vpop.f32.mrb[11].mxu0 }
 0x10e   : > { %v691_v42 = vpack.c.bf16 %v563_v41, %v560_v38 }
 0x112   : > { %v1428_v43 = vpop.f32.mrb[12].mxu0 }
 0x113   : > { %v576_v44 = vpop.f32.mrb[13].mxu0 }
 0x114   : > { %v1429_v45 = vpop.f32.mrb[14].mxu0 }
 0x115   : > { %v694_v46 = vpack.c.bf16 %v1429_v45, %v1428_v43  ;;  %v579_v47 = vpop.f32.mrb[15].mxu0 }
 0x116   : > { %v693_v48 = vpack.c.bf16 %v579_v47, %v576_v44 }
 0x11a   : > { %v1432_v49 = vpop.f32.mrb[16].mxu0 }
 0x11b   : > { %v592_v50 = vpop.f32.mrb[17].mxu0 }
 0x11c   : > { %v1433_v51 = vpop.f32.mrb[18].mxu0 }
 0x11d   : > { %v696_v52 = vpack.c.bf16 %v1433_v51, %v1432_v49  ;;  %v595_v53 = vpop.f32.mrb[19].mxu0 }
 0x11e   : > { %v695_v54 = vpack.c.bf16 %v595_v53, %v592_v50 }
 0x120   : > { %1334 = vmatprep.subr.bf16.mxu1 %v695_v54 }
 0x121   : > { %1335 = vmatpush3.bf16.msra.mxu1 %v687_v30 }
 0x122   : > { %v1436_v55 = vpop.f32.mrb[20].mxu0  ;;  %1336 = vmatprep.subr.bf16.mxu1 %v696_v52 }
 0x123   : > { %v608_v56 = vpop.f32.mrb[21].mxu0 }
 0x124   : > { %v1437_v57 = vpop.f32.mrb[22].mxu0 }
 0x125   : > { %v698_v58 = vpack.c.bf16 %v1437_v57, %v1436_v55  ;;  %v611_v59 = vpop.f32.mrb[23].mxu0  ;;  %1337 = vmatpush3.bf16.msra.mxu1 %v688_v28 }
 0x126   : > { %v697_v60 = vpack.c.bf16 %v611_v59, %v608_v56 }
 0x128   : > { %1338 = vmatprep.subr.bf16.mxu1 %v697_v60 }
 0x129   : > { %1339 = vmatpush3.bf16.msra.mxu1 %v689_v36 }
 0x12a   : > { %v1440_v61 = vpop.f32.mrb[24].mxu0  ;;  %1340 = vmatprep.subr.bf16.mxu1 %v698_v58 }
 0x12b   : > { %v624_v62 = vpop.f32.mrb[25].mxu0 }
 0x12c   : > { %v1441_v63 = vpop.f32.mrb[26].mxu0 }
 0x12d   : > { %v700_v0 = vpack.c.bf16 %v1441_v63, %v1440_v61  ;;  %v627_v1 = vpop.f32.mrb[27].mxu0  ;;  %1341 = vmatpush3.bf16.msra.mxu1 %v690_v34 }
 0x12e   : > { %v699_v2 = vpack.c.bf16 %v627_v1, %v624_v62 }
 0x130   : > { %1342 = vmatprep.subr.bf16.mxu1 %v699_v2 }
 0x131   : > { %1343 = vmatpush3.bf16.msra.mxu1 %v691_v42 }
 0x132   : > { %v1444_v3 = vpop.f32.mrb[28].mxu0  ;;  %1344 = vmatprep.subr.bf16.mxu1 %v700_v0 }
 0x133   : > { %v640_v4 = vpop.f32.mrb[29].mxu0 }
 0x134   : > { %v1445_v5 = vpop.f32.mrb[30].mxu0 }
 0x135   : > { %v702_v6 = vpack.c.bf16 %v1445_v5, %v1444_v3  ;;  %v643_v7 = vpop.f32.mrb[31].mxu0  ;;  %1345 = vmatpush3.bf16.msra.mxu1 %v692_v40 }
 0x136   : > { %v701_v8 = vpack.c.bf16 %v643_v7, %v640_v4 }
 0x138   : > { %1346 = vmatprep.subr.bf16.mxu1 %v701_v8 }
 0x139   : > { %1347 = vmatpush3.bf16.msra.mxu1 %v693_v48 }
 0x13a   : > { %1348 = vmatprep.subr.bf16.mxu1 %v702_v6 }
 0x13d   : > { %1349 = vmatpush3.bf16.msra.mxu1 %v694_v46 }
 0x140   : > { %816 = vmatmul.mubr.bf16.vlgmr.msra.gmra.mrb[0].mxu1 %v1494_v9 }
 0x141   : > { %823 = vmatprep.mubr.bf16.mxu1 %v1497_v10 }
 0x148   : > { %824 = vmatmul.mubr.bf16.gmra.mrb[4].mxu1 %v1499_v11 }
 0x149   : > { %831 = vmatprep.mubr.bf16.mxu1 %v1500_v12 }
 0x150   : > { %832 = vmatmul.mubr.bf16.gmra.mrb[8].mxu1 %v1502_v13 }
 0x151   : > { %839 = vmatprep.mubr.bf16.mxu1 %v1503_v14 }
 0x158   : > { %840 = vmatmul.mubr.bf16.gmra.mrb[12].mxu1 %v1505_v15 }
 0x159   : > { %847 = vmatprep.mubr.bf16.mxu1 %v1506_v16 }
 0x160   : > { %848 = vmatmul.mubr.bf16.gmra.mrb[16].mxu1 %v1508_v17 }
 0x161   : > { %855 = vmatprep.mubr.bf16.mxu1 %v1509_v18 }
 0x168   : > { %856 = vmatmul.mubr.bf16.gmra.mrb[20].mxu1 %v1511_v19 }
 0x169   : > { %863 = vmatprep.mubr.bf16.mxu1 %v1512_v20 }
 0x170   : > { %864 = vmatmul.mubr.bf16.gmra.mrb[24].mxu1 %v1514_v21 }
 0x171   : > { %871 = vmatprep.mubr.bf16.mxu1 %v1515_v22 }
 0x178   : > { %872 = vmatmul.mubr.bf16.gmra.mrb[28].mxu1 %v1517_v23 }
 0x213   : > { %v1350_v24 = vpop.f32.mrb[0].mxu1 }
 0x214   : > { %v1351_v25 = vpop.f32.mrb[1].mxu1 }
 0x215   : > { %v1352_v27 = vadd.f32 %v1351_v25, %v1350_v24  ;;  %v1353_v28 = vpop.f32.mrb[2].mxu1 }
 0x216   : > { %v1354_v30 = vpop.f32.mrb[3].mxu1 }
 0x217   : > { %v938_v31 = vadd.f32 %v1352_v27, %v1692_v26  ;;  %v1355_v32 = vadd.f32 %v1354_v30, %v1353_v28 }
 0x219   : > { %v977_v33 = vmul.f32 %v1697_v29, %v938_v31  ;;  %v939_v34 = vadd.f32 %v1355_v32, %v1692_v26  ;;  %vm954_vm0 = vcmp.gt.f32.partialorder %v938_v31, 0.0 }
 0x21b   : > { %vm955_vm1 = vcmp.gt.f32.partialorder %v939_v34, 0.0  ;;  %v978_v35 = vmul.f32 %v1697_v29, %v939_v34  ;;  %v1356_v36 = vpop.f32.mrb[4].mxu1  ;;  %v993_v38 = vsel %vm954_vm0, %v938_v31, %v977_v33 }
 0x21c   : > { %v1357_v37 = vpop.f32.mrb[5].mxu1 }
 0x21d   : > { %v994_v39 = vsel %vm955_vm1, %v939_v34, %v978_v35  ;;  %v1358_v40 = vadd.f32 %v1357_v37, %v1356_v36  ;;  %v1359_v41 = vpop.f32.mrb[6].mxu1 }
 0x21e   : > { %v1266_v42 = vpack.c.bf16 %v994_v39, %v993_v38  ;;  %v1360_v43 = vpop.f32.mrb[7].mxu1 }
 0x21f   : > { %v940_v44 = vadd.f32 %v1358_v40, %v1692_v26  ;;  %v1361_v45 = vadd.f32 %v1360_v43, %v1359_v41 }
 0x220   : > { %1267 = vst [vmem:[%s1707_s14] sm:$0xff] %v1266_v42  }
 0x221   : > { %v979_v46 = vmul.f32 %v1697_v29, %v940_v44  ;;  %v941_v47 = vadd.f32 %v1361_v45, %v1692_v26  ;;  %vm956_vm2 = vcmp.gt.f32.partialorder %v940_v44, 0.0 }
 0x223   : > { %vm957_vm3 = vcmp.gt.f32.partialorder %v941_v47, 0.0  ;;  %v980_v48 = vmul.f32 %v1697_v29, %v941_v47  ;;  %v1362_v49 = vpop.f32.mrb[8].mxu1  ;;  %v995_v51 = vsel %vm956_vm2, %v940_v44, %v979_v46 }
 0x224   : > { %v1363_v50 = vpop.f32.mrb[9].mxu1 }
 0x225   : > { %v996_v52 = vsel %vm957_vm3, %v941_v47, %v980_v48  ;;  %v1364_v53 = vadd.f32 %v1363_v50, %v1362_v49  ;;  %v1365_v54 = vpop.f32.mrb[10].mxu1 }
 0x226   : > { %v1271_v55 = vpack.c.bf16 %v996_v52, %v995_v51  ;;  %v1366_v56 = vpop.f32.mrb[11].mxu1 }
 0x227   : > { %v942_v57 = vadd.f32 %v1364_v53, %v1692_v26  ;;  %v1367_v58 = vadd.f32 %v1366_v56, %v1365_v54 }
 0x228   : > { %1303 = vst [vmem:[%s1707_s14 + $0x8] sm:$0xff] %v1271_v55  }
 0x229   : > { %v981_v59 = vmul.f32 %v1697_v29, %v942_v57  ;;  %v943_v60 = vadd.f32 %v1367_v58, %v1692_v26  ;;  %vm958_vm4 = vcmp.gt.f32.partialorder %v942_v57, 0.0 }
 0x22b   : > { %vm959_vm5 = vcmp.gt.f32.partialorder %v943_v60, 0.0  ;;  %v982_v61 = vmul.f32 %v1697_v29, %v943_v60  ;;  %v1368_v62 = vpop.f32.mrb[12].mxu1  ;;  %v997_v0 = vsel %vm958_vm4, %v942_v57, %v981_v59 }
 0x22c   : > { %v1369_v63 = vpop.f32.mrb[13].mxu1 }
 0x22d   : > { %v998_v1 = vsel %vm959_vm5, %v943_v60, %v982_v61  ;;  %v1370_v2 = vadd.f32 %v1369_v63, %v1368_v62  ;;  %v1371_v3 = vpop.f32.mrb[14].mxu1 }
 0x22e   : > { %v1276_v4 = vpack.c.bf16 %v998_v1, %v997_v0  ;;  %v1372_v5 = vpop.f32.mrb[15].mxu1 }
 0x22f   : > { %v944_v6 = vadd.f32 %v1370_v2, %v1692_v26  ;;  %v1373_v7 = vadd.f32 %v1372_v5, %v1371_v3 }
 0x230   : > { %1304 = vst [vmem:[%s1707_s14 + $0x10] sm:$0xff] %v1276_v4  }
 0x231   : > { %v983_v8 = vmul.f32 %v1697_v29, %v944_v6  ;;  %v945_v9 = vadd.f32 %v1373_v7, %v1692_v26  ;;  %vm960_vm6 = vcmp.gt.f32.partialorder %v944_v6, 0.0 }
 0x233   : > { %vm961_vm7 = vcmp.gt.f32.partialorder %v945_v9, 0.0  ;;  %v984_v10 = vmul.f32 %v1697_v29, %v945_v9  ;;  %v1374_v11 = vpop.f32.mrb[16].mxu1  ;;  %v999_v13 = vsel %vm960_vm6, %v944_v6, %v983_v8 }
 0x234   : > { %v1375_v12 = vpop.f32.mrb[17].mxu1 }
 0x235   : > { %v1000_v14 = vsel %vm961_vm7, %v945_v9, %v984_v10  ;;  %v1376_v15 = vadd.f32 %v1375_v12, %v1374_v11  ;;  %v1377_v16 = vpop.f32.mrb[18].mxu1 }
 0x236   : > { %v1281_v17 = vpack.c.bf16 %v1000_v14, %v999_v13  ;;  %v1378_v18 = vpop.f32.mrb[19].mxu1 }
 0x237   : > { %v946_v19 = vadd.f32 %v1376_v15, %v1692_v26  ;;  %v1379_v20 = vadd.f32 %v1378_v18, %v1377_v16 }
 0x238   : > { %1305 = vst [vmem:[%s1707_s14 + $0x18] sm:$0xff] %v1281_v17  }
 0x239   : > { %v985_v21 = vmul.f32 %v1697_v29, %v946_v19  ;;  %v947_v22 = vadd.f32 %v1379_v20, %v1692_v26  ;;  %vm962_vm8 = vcmp.gt.f32.partialorder %v946_v19, 0.0 }
 0x23b   : > { %vm963_vm9 = vcmp.gt.f32.partialorder %v947_v22, 0.0  ;;  %v986_v23 = vmul.f32 %v1697_v29, %v947_v22  ;;  %v1380_v24 = vpop.f32.mrb[20].mxu1  ;;  %v1001_v27 = vsel %vm962_vm8, %v946_v19, %v985_v21 }
 0x23c   : > { %v1381_v25 = vpop.f32.mrb[21].mxu1 }
 0x23d   : > { %v1002_v28 = vsel %vm963_vm9, %v947_v22, %v986_v23  ;;  %v1382_v30 = vadd.f32 %v1381_v25, %v1380_v24  ;;  %v1383_v31 = vpop.f32.mrb[22].mxu1 }
 0x23e   : > { %v1286_v32 = vpack.c.bf16 %v1002_v28, %v1001_v27  ;;  %v1384_v33 = vpop.f32.mrb[23].mxu1 }
 0x23f   : > { %v948_v34 = vadd.f32 %v1382_v30, %v1692_v26  ;;  %v1385_v35 = vadd.f32 %v1384_v33, %v1383_v31 }
 0x240   : > { %1306 = vst [vmem:[%s1707_s14 + $0x20] sm:$0xff] %v1286_v32  }
 0x241   : > { %v987_v36 = vmul.f32 %v1697_v29, %v948_v34  ;;  %v949_v37 = vadd.f32 %v1385_v35, %v1692_v26  ;;  %vm964_vm10 = vcmp.gt.f32.partialorder %v948_v34, 0.0 }
 0x243   : > { %vm965_vm11 = vcmp.gt.f32.partialorder %v949_v37, 0.0  ;;  %v988_v38 = vmul.f32 %v1697_v29, %v949_v37  ;;  %v1386_v39 = vpop.f32.mrb[24].mxu1  ;;  %v1003_v41 = vsel %vm964_vm10, %v948_v34, %v987_v36 }
 0x244   : > { %v1387_v40 = vpop.f32.mrb[25].mxu1 }
 0x245   : > { %v1004_v42 = vsel %vm965_vm11, %v949_v37, %v988_v38  ;;  %v1388_v43 = vadd.f32 %v1387_v40, %v1386_v39  ;;  %v1389_v44 = vpop.f32.mrb[26].mxu1 }
 0x246   : > { %v1291_v45 = vpack.c.bf16 %v1004_v42, %v1003_v41  ;;  %v1390_v46 = vpop.f32.mrb[27].mxu1 }
 0x247   : > { %v950_v47 = vadd.f32 %v1388_v43, %v1692_v26  ;;  %v1391_v48 = vadd.f32 %v1390_v46, %v1389_v44 }
 0x248   : > { %1307 = vst [vmem:[%s1707_s14 + $0x28] sm:$0xff] %v1291_v45  }
 0x249   : > { %v989_v49 = vmul.f32 %v1697_v29, %v950_v47  ;;  %v951_v50 = vadd.f32 %v1391_v48, %v1692_v26  ;;  %vm966_vm12 = vcmp.gt.f32.partialorder %v950_v47, 0.0 }
 0x24b   : > { %vm967_vm13 = vcmp.gt.f32.partialorder %v951_v50, 0.0  ;;  %v990_v51 = vmul.f32 %v1697_v29, %v951_v50  ;;  %v1392_v52 = vpop.f32.mrb[28].mxu1  ;;  %v1005_v54 = vsel %vm966_vm12, %v950_v47, %v989_v49 }
 0x24c   : > { %v1393_v53 = vpop.f32.mrb[29].mxu1 }
 0x24d   : > { %v1006_v55 = vsel %vm967_vm13, %v951_v50, %v990_v51  ;;  %v1394_v56 = vadd.f32 %v1393_v53, %v1392_v52  ;;  %v1395_v57 = vpop.f32.mrb[30].mxu1 }
 0x24e   : > { %v1296_v58 = vpack.c.bf16 %v1006_v55, %v1005_v54  ;;  %v1396_v59 = vpop.f32.mrb[31].mxu1 }
 0x24f   : > { %v952_v60 = vadd.f32 %v1394_v56, %v1692_v26  ;;  %v1397_v61 = vadd.f32 %v1396_v59, %v1395_v57 }
 0x250   : > { %1308 = vst [vmem:[%s1707_s14 + $0x30] sm:$0xff] %v1296_v58  }
 0x251   : > { %v991_v62 = vmul.f32 %v1697_v29, %v952_v60  ;;  %v953_v63 = vadd.f32 %v1397_v61, %v1692_v26  ;;  %vm968_vm14 = vcmp.gt.f32.partialorder %v952_v60, 0.0 }
 0x253   : > { %vm969_vm15 = vcmp.gt.f32.partialorder %v953_v63, 0.0  ;;  %v992_v0 = vmul.f32 %v1697_v29, %v953_v63  ;;  %v1007_v1 = vsel %vm968_vm14, %v952_v60, %v991_v62 }
 0x255   : > { %v1008_v2 = vsel %vm969_vm15, %v953_v63, %v992_v0 }
 0x256   : > { %v1301_v3 = vpack.c.bf16 %v1008_v2, %v1007_v1 }
 0x258   : > { %1309 = vst [vmem:[%s1707_s14 + $0x38] sm:$0xff] %v1301_v3  }
 0x259 PF: > { %s15_s20 = sadd.s32 1, %s1540_s20   ;;  %s1760_s18 = smov %s1536_s19 }
 0x25a   : > { %p12_p5 = scmp.ge.s32.totalorder %s15_s20, 4   ;;  %s1761_s19 = smov %s1763_s21 }
 0x25c   :  { %14 = sbr.rel (!%p12_p5) target bundleno = 2 (0x2), region = 81 }

// kernel: gnn_net_forward.3
= control target key start
LH: loop header
LB: loop body
LE: loop exit
PB: predicated region body
PF: predicated region fallthrough
CT: control target
= control target key end

     0   :  { %s1823_s18 = smov 0   ;;  %s1825_s19 = smov 0   ;;  %s2152_s0 = inlined_call_operand.vmem [shape: bf16[256,256], index: 0, kind: input, shape index: {}]   ;;  %s2153_s1 = inlined_call_operand.vmem [shape: bf16[256,256], index: 1, kind: input, shape index: {}]   ;;  %s2154_s2 = inlined_call_operand.vmem [shape: bf16[256,128], index: 2, kind: input, shape index: {}]   ;;  %s2155_s3 = inlined_call_operand.vmem [shape: f32[1,128], index: 3, kind: input, shape index: {}]   ;;  %s2156_s4 = inlined_call_operand.vmem [shape: f32[1,128], index: 4, kind: input, shape index: {}]   ;;  %s2157_s5 = inlined_call_operand.vmem [shape: bf16[256,128], index: 5, kind: output, shape index: {}]  }
   0x1   :  { %s1827_s20 = smov 0  }
   0x2 LB: > { %s27_s21 = sadd.s32 1, %s1787_s19  ;;  %p1311_p0 = scmp.ge.s32.totalorder %s1791_s20, 1  ;;  %s1791_s20 = sphi %s1827_s20, %s15_s20   ;;  %s1787_s19 = sphi %s1825_s19, %s2159_s19   ;;  %s1783_s18 = sphi %s1823_s18, %s2158_s18  }
   0x3   : > { %p29_p1 = scmp.ge.s32.totalorder %s27_s21, 2  ;;  %p220_p2 = scmp.lt.s32.totalorder %s1791_s20, 3 }
   0x5   : > { %s2161_s21 = smov (%p29_p1, %s27_s21), 0  ;;  %p221_p3 = pnand %p1311_p0, %p220_p2 }
   0x6   : > { %v1681_v0 = vld [vmem:[%s2154_s2 + $0x40] sm:$0xff] (!%p221_p3)   ;;  %v1683_v2 = vld [vmem:[%s2154_s2 + $0x48] sm:$0xff] (!%p221_p3)   ;;  %v1685_v4 = vld [vmem:[%s2154_s2 + $0x50] sm:$0xff] (!%p221_p3)   ;;  %s1312_s9 = sshll.u32 (!%p221_p3), %s1783_s18, 4 }
   0x7   : > { %224 = sbr.rel (%p221_p3) target bundleno = 647 (0x287), region = 40  ;;  %v1682_v1 = vld [vmem:[%s2154_s2] sm:$0xff] (!%p221_p3)   ;;  %1465 = vmatprep.subr.bf16.mxu0 (!%p221_p3), %v1681_v0  ;;  %1641 = vmatprep.subr.bf16.mxu1 (!%p221_p3), %v1681_v0  ;;  %v1684_v3 = vld [vmem:[%s2154_s2 + $0x8] sm:$0xff] (!%p221_p3)   ;;  %v1686_v5 = vld [vmem:[%s2154_s2 + $0x10] sm:$0xff] (!%p221_p3)   ;;  %p261_p4 = scmp.lt.s32.totalorder (!%p221_p3), %s1312_s9, 31 }
   0x8   : > { %1466 = vmatpush3.bf16.msra.mxu0 (!%p221_p3), %v1682_v1  ;;  %1649 = vmatpush3.bf16.msra.mxu1 (!%p221_p3), %v1682_v1  ;;  %v1687_v6 = vld [vmem:[%s2154_s2 + $0x58] sm:$0xff] (!%p221_p3)   ;;  %v1689_v8 = vld [vmem:[%s2154_s2 + $0x60] sm:$0xff] (!%p221_p3)   ;;  %v1691_v10 = vld [vmem:[%s2154_s2 + $0x68] sm:$0xff] (!%p221_p3)  }
   0x9   : > { %1467 = vmatprep.subr.bf16.mxu0 (!%p221_p3), %v1683_v2  ;;  %1642 = vmatprep.subr.bf16.mxu1 (!%p221_p3), %v1683_v2  ;;  %v1688_v7 = vld [vmem:[%s2154_s2 + $0x18] sm:$0xff] (!%p221_p3)   ;;  %v1690_v9 = vld [vmem:[%s2154_s2 + $0x20] sm:$0xff] (!%p221_p3)   ;;  %v1692_v12 = vld [vmem:[%s2154_s2 + $0x28] sm:$0xff] (!%p221_p3)  }
   0xa   : > { %v1699_v11 = vld [vmem:[%s2153_s1 + $0x4] ss:$8 sps:$4 sm:$0xff] (!%p221_p3)   ;;  %v1693_v13 = vld [vmem:[%s2154_s2 + $0x70] sm:$0xff] (!%p221_p3)   ;;  %v1695_v15 = vld [vmem:[%s2154_s2 + $0x78] sm:$0xff] (!%p221_p3)  }
   0xb   : > { %657 = vmatprep.mubr.bf16.mxu0 (!%p221_p3), %v1699_v11  ;;  %v1694_v14 = vld [vmem:[%s2154_s2 + $0x30] sm:$0xff] (!%p221_p3)   ;;  %v1696_v16 = vld [vmem:[%s2154_s2 + $0x38] sm:$0xff] (!%p221_p3)   ;;  %v1697_v17 = vld [vmem:[%s2153_s1] ss:$8 sps:$4 sm:$0xff] (!%p221_p3)  }
   0xc   : > { %1468 = vmatpush3.bf16.msra.mxu0 (!%p221_p3), %v1684_v3  ;;  %1650 = vmatpush3.bf16.msra.mxu1 (!%p221_p3), %v1684_v3  ;;  %v1729_v18 = vld [vmem:[%s2153_s1 + $0xc4] ss:$8 sps:$4 sm:$0xff] (!%p221_p3)   ;;  %v1700_v19 = vld [vmem:[%s2153_s1 + $0x14] ss:$8 sps:$4 sm:$0xff] (!%p221_p3)   ;;  %v1727_v20 = vld [vmem:[%s2153_s1 + $0xc0] ss:$8 sps:$4 sm:$0xff] (!%p221_p3)  }
   0xd   : > { %1469 = vmatprep.subr.bf16.mxu0 (!%p221_p3), %v1685_v4  ;;  %1643 = vmatprep.subr.bf16.mxu1 (!%p221_p3), %v1685_v4  ;;  %v1733_v21 = vld [vmem:[%s2153_s1 + $0xd4] ss:$8 sps:$4 sm:$0xff] (!%p221_p3)   ;;  %v1702_v22 = vld [vmem:[%s2153_s1 + $0x10] ss:$8 sps:$4 sm:$0xff] (!%p221_p3)   ;;  %v1703_v23 = vld [vmem:[%s2153_s1 + $0x24] ss:$8 sps:$4 sm:$0xff] (!%p221_p3)  }
   0xe   : > { %753 = vmatprep.mubr.bf16.mxu1 %v1729_v18  ;;  %v1735_v24 = vld [vmem:[%s2153_s1 + $0xd0] ss:$8 sps:$4 sm:$0xff]   ;;  %v1739_v25 = vld [vmem:[%s2153_s1 + $0xe4] ss:$8 sps:$4 sm:$0xff]   ;;  %v1705_v26 = vld [vmem:[%s2153_s1 + $0x20] ss:$8 sps:$4 sm:$0xff]  }
   0xf   : > { %v1706_v27 = vld [vmem:[%s2153_s1 + $0x34] ss:$8 sps:$4 sm:$0xff]   ;;  %v1741_v28 = vld [vmem:[%s2153_s1 + $0xe0] ss:$8 sps:$4 sm:$0xff]   ;;  %v1708_v30 = vld [vmem:[%s2153_s1 + $0x30] ss:$8 sps:$4 sm:$0xff]  }
  0x10   : > { %1470 = vmatpush3.bf16.msra.mxu0 %v1686_v5  ;;  %1651 = vmatpush3.bf16.msra.mxu1 %v1686_v5  ;;  %v1742_v29 = vld [vmem:[%s2153_s1 + $0xf4] ss:$8 sps:$4 sm:$0xff]   ;;  %v1709_v31 = vld [vmem:[%s2153_s1 + $0x44] ss:$8 sps:$4 sm:$0xff]   ;;  %v1744_v32 = vld [vmem:[%s2153_s1 + $0xf0] ss:$8 sps:$4 sm:$0xff]  }
  0x11   : > { %1471 = vmatprep.subr.bf16.mxu0 %v1687_v6  ;;  %1644 = vmatprep.subr.bf16.mxu1 %v1687_v6  ;;  %v1711_v33 = vld [vmem:[%s2153_s1 + $0x40] ss:$8 sps:$4 sm:$0xff]   ;;  %v1712_v34 = vld [vmem:[%s2153_s1 + $0x54] ss:$8 sps:$4 sm:$0xff]   ;;  %v1714_v35 = vld [vmem:[%s2153_s1 + $0x50] ss:$8 sps:$4 sm:$0xff]  }
  0x12   : > { %v1715_v36 = vld [vmem:[%s2153_s1 + $0x64] ss:$8 sps:$4 sm:$0xff]   ;;  %v1717_v37 = vld [vmem:[%s2153_s1 + $0x60] ss:$8 sps:$4 sm:$0xff]   ;;  %v1718_v38 = vld [vmem:[%s2153_s1 + $0x74] ss:$8 sps:$4 sm:$0xff]  }
  0x13   : > { %v1720_v39 = vld [vmem:[%s2153_s1 + $0x70] ss:$8 sps:$4 sm:$0xff]   ;;  %v1721_v40 = vld [vmem:[%s2153_s1 + $0x84] ss:$8 sps:$4 sm:$0xff]   ;;  %v1723_v41 = vld [vmem:[%s2153_s1 + $0x80] ss:$8 sps:$4 sm:$0xff]  }
  0x14   : > { %1472 = vmatpush3.bf16.msra.mxu0 %v1688_v7  ;;  %1652 = vmatpush3.bf16.msra.mxu1 %v1688_v7  ;;  %v1724_v42 = vld [vmem:[%s2153_s1 + $0x94] ss:$8 sps:$4 sm:$0xff]   ;;  %v1726_v43 = vld [vmem:[%s2153_s1 + $0x90] ss:$8 sps:$4 sm:$0xff]   ;;  %v1730_v44 = vld [vmem:[%s2153_s1 + $0xa4] ss:$8 sps:$4 sm:$0xff]  }
  0x15   : > { %1473 = vmatprep.subr.bf16.mxu0 %v1689_v8  ;;  %1645 = vmatprep.subr.bf16.mxu1 %v1689_v8  ;;  %v1732_v45 = vld [vmem:[%s2153_s1 + $0xa0] ss:$8 sps:$4 sm:$0xff]   ;;  %v1736_v46 = vld [vmem:[%s2153_s1 + $0xb4] ss:$8 sps:$4 sm:$0xff]   ;;  %v1738_v47 = vld [vmem:[%s2153_s1 + $0xb0] ss:$8 sps:$4 sm:$0xff]  }
  0x16   : > { %s2163_s9 = smov (!%p261_p4, %s1312_s9), 31 }
  0x17   : > { %s1401_s10 = sshll.u32 %s2163_s9, 3  ;;  %s1316_s17 = sshll.u32 %s2163_s9, 2 }
  0x18   : > { %1474 = vmatpush3.bf16.msra.mxu0 %v1690_v9  ;;  %1653 = vmatpush3.bf16.msra.mxu1 %v1690_v9  ;;  %s1994_s13 = scalar_lea.vmem %s2152_s0, %s1401_s10  ;;  %s2105_s24 = scalar_lea.vmem %s2157_s5, %s1316_s17 }
  0x19   : > { %1475 = vmatprep.subr.bf16.mxu0 %v1691_v10  ;;  %1646 = vmatprep.subr.bf16.mxu1 %v1691_v10  ;;  %v1747_v48 = vld [vmem:[%s1994_s13 + $0x4] ss:$8 sps:$4 sm:$0xff]  }
  0x1c   : > { %1476 = vmatpush3.bf16.msra.mxu0 %v1692_v12  ;;  %1654 = vmatpush3.bf16.msra.mxu1 %v1692_v12 }
  0x1d   : > { %1477 = vmatprep.subr.bf16.mxu0 %v1693_v13  ;;  %1647 = vmatprep.subr.bf16.mxu1 %v1693_v13 }
  0x20   : > { %1478 = vmatpush3.bf16.msra.mxu0 %v1694_v14  ;;  %1655 = vmatpush3.bf16.msra.mxu1 %v1694_v14 }
  0x21   : > { %1479 = vmatprep.subr.bf16.mxu0 %v1695_v15  ;;  %1648 = vmatprep.subr.bf16.mxu1 %v1695_v15 }
  0x24   : > { %1480 = vmatpush3.bf16.msra.mxu0 %v1696_v16  ;;  %1656 = vmatpush3.bf16.msra.mxu1 %v1696_v16 }
  0x27   : > { %658 = vmatmul.mubr.bf16.vlgmr.msra.gmra.mrb[0].mxu0 %v1697_v17  ;;  %754 = vmatmul.mubr.bf16.vlgmr.msra.gmra.mrb[0].mxu1 %v1727_v20 }
  0x28   : > { %665 = vmatprep.mubr.bf16.mxu0 %v1700_v19  ;;  %761 = vmatprep.mubr.bf16.mxu1 %v1733_v21 }
  0x2f   : > { %666 = vmatmul.mubr.bf16.gmra.mrb[4].mxu0 %v1702_v22  ;;  %762 = vmatmul.mubr.bf16.gmra.mrb[4].mxu1 %v1735_v24 }
  0x30   : > { %673 = vmatprep.mubr.bf16.mxu0 %v1703_v23  ;;  %769 = vmatprep.mubr.bf16.mxu1 %v1739_v25 }
  0x37   : > { %674 = vmatmul.mubr.bf16.gmra.mrb[8].mxu0 %v1705_v26  ;;  %770 = vmatmul.mubr.bf16.gmra.mrb[8].mxu1 %v1741_v28 }
  0x38   : > { %681 = vmatprep.mubr.bf16.mxu0 %v1706_v27  ;;  %777 = vmatprep.mubr.bf16.mxu1 %v1742_v29 }
  0x3f   : > { %682 = vmatmul.mubr.bf16.gmra.mrb[12].mxu0 %v1708_v30  ;;  %778 = vmatmul.mubr.bf16.gmra.mrb[12].mxu1 %v1744_v32 }
  0x40   : > { %689 = vmatprep.mubr.bf16.mxu0 %v1709_v31  ;;  %946 = vmatprep.mubr.bf16.mxu1 %v1747_v48 }
  0x47   : > { %690 = vmatmul.mubr.bf16.gmra.mrb[16].mxu0 %v1711_v33 }
  0x48   : > { %697 = vmatprep.mubr.bf16.mxu0 %v1712_v34 }
  0x4f   : > { %698 = vmatmul.mubr.bf16.gmra.mrb[20].mxu0 %v1714_v35 }
  0x50   : > { %705 = vmatprep.mubr.bf16.mxu0 %v1715_v36 }
  0x57   : > { %706 = vmatmul.mubr.bf16.gmra.mrb[24].mxu0 %v1717_v37 }
  0x58   : > { %713 = vmatprep.mubr.bf16.mxu0 %v1718_v38 }
  0x5f   : > { %714 = vmatmul.mubr.bf16.gmra.mrb[28].mxu0 %v1720_v39 }
  0x60   : > { %721 = vmatprep.mubr.bf16.mxu0 %v1721_v40 }
  0x67   : > { %722 = vmatmul.mubr.bf16.gmra.mrb[32].mxu0 %v1723_v41 }
  0x68   : > { %729 = vmatprep.mubr.bf16.mxu0 %v1724_v42 }
  0x6f   : > { %730 = vmatmul.mubr.bf16.gmra.mrb[36].mxu0 %v1726_v43 }
  0x70   : > { %737 = vmatprep.mubr.bf16.mxu0 %v1730_v44 }
  0x77   : > { %738 = vmatmul.mubr.bf16.gmra.mrb[40].mxu0 %v1732_v45 }
  0x78   : > { %745 = vmatprep.mubr.bf16.mxu0 %v1736_v46 }
  0x7f   : > { %746 = vmatmul.mubr.bf16.gmra.mrb[44].mxu0 %v1738_v47 }
  0xfa   : > { %v1481_v49 = vpop.f32.mrb[0].mxu0  ;;  %v1553_v51 = vpop.f32.mrb[0].mxu1 }
  0xfb   : > { %v1482_v50 = vpop.f32.mrb[1].mxu0  ;;  %v1554_v54 = vpop.f32.mrb[1].mxu1 }
  0xfc   : > { %v1997_v52 = vadd.f32 %v1482_v50, %v1481_v49  ;;  %v1484_v53 = vpop.f32.mrb[2].mxu0  ;;  %v1999_v56 = vadd.f32 %v1554_v54, %v1553_v51  ;;  %v1556_v57 = vpop.f32.mrb[2].mxu1 }
  0xfd   : > { %v1485_v55 = vpop.f32.mrb[3].mxu0  ;;  %v1557_v59 = vpop.f32.mrb[3].mxu1 }
  0xfe   : > { %v2001_v58 = vadd.f32 %v1485_v55, %v1484_v53  ;;  %v2003_v60 = vadd.f32 %v1557_v59, %v1556_v57 }
 0x100   : > { %v818_v61 = vpack.c.bf16 %v2001_v58, %v1997_v52  ;;  %v830_v62 = vpack.c.bf16 %v2003_v60, %v1999_v56  ;;  %v1745_v56 = vld [vmem:[%s1994_s13] ss:$8 sps:$4 sm:$0xff]   ;;  %v1748_v60 = vld [vmem:[%s1994_s13 + $0x14] ss:$8 sps:$4 sm:$0xff]  }
 0x102   : > { %v1487_v63 = vpop.f32.mrb[4].mxu0  ;;  %v1559_v1 = vpop.f32.mrb[4].mxu1 }
 0x103   : > { %v1488_v0 = vpop.f32.mrb[5].mxu0  ;;  %v1560_v4 = vpop.f32.mrb[5].mxu1 }
 0x104   : > { %v2009_v2 = vadd.f32 %v1488_v0, %v1487_v63  ;;  %v1490_v3 = vpop.f32.mrb[6].mxu0  ;;  %v2011_v6 = vadd.f32 %v1560_v4, %v1559_v1  ;;  %v1562_v7 = vpop.f32.mrb[6].mxu1 }
 0x105   : > { %v1491_v5 = vpop.f32.mrb[7].mxu0  ;;  %v1563_v9 = vpop.f32.mrb[7].mxu1 }
 0x106   : > { %v2013_v8 = vadd.f32 %v1491_v5, %v1490_v3  ;;  %v2015_v10 = vadd.f32 %v1563_v9, %v1562_v7 }
 0x108   : > { %v819_v11 = vpack.c.bf16 %v2013_v8, %v2009_v2  ;;  %v831_v12 = vpack.c.bf16 %v2015_v10, %v2011_v6  ;;  %v1751_v6 = vld [vmem:[%s1994_s13 + $0x24] ss:$8 sps:$4 sm:$0xff]   ;;  %v1753_v8 = vld [vmem:[%s1994_s13 + $0x20] ss:$8 sps:$4 sm:$0xff]   ;;  %v1754_v10 = vld [vmem:[%s1994_s13 + $0x34] ss:$8 sps:$4 sm:$0xff]  }
 0x10a   : > { %v1493_v13 = vpop.f32.mrb[8].mxu0  ;;  %v1565_v15 = vpop.f32.mrb[8].mxu1 }
 0x10b   : > { %v1494_v14 = vpop.f32.mrb[9].mxu0  ;;  %v1566_v18 = vpop.f32.mrb[9].mxu1 }
 0x10c   : > { %v2021_v16 = vadd.f32 %v1494_v14, %v1493_v13  ;;  %v1496_v17 = vpop.f32.mrb[10].mxu0  ;;  %v2023_v20 = vadd.f32 %v1566_v18, %v1565_v15  ;;  %v1568_v21 = vpop.f32.mrb[10].mxu1 }
 0x10d   : > { %v1497_v19 = vpop.f32.mrb[11].mxu0  ;;  %v1569_v23 = vpop.f32.mrb[11].mxu1 }
 0x10e   : > { %v2025_v22 = vadd.f32 %v1497_v19, %v1496_v17  ;;  %v2027_v24 = vadd.f32 %v1569_v23, %v1568_v21 }
 0x110   : > { %v820_v25 = vpack.c.bf16 %v2025_v22, %v2021_v16  ;;  %v832_v26 = vpack.c.bf16 %v2027_v24, %v2023_v20  ;;  %v1759_v16 = vld [vmem:[%s1994_s13 + $0x40] ss:$8 sps:$4 sm:$0xff]   ;;  %v1760_v20 = vld [vmem:[%s1994_s13 + $0x54] ss:$8 sps:$4 sm:$0xff]   ;;  %v1762_v22 = vld [vmem:[%s1994_s13 + $0x50] ss:$8 sps:$4 sm:$0xff]  }
 0x111   : > { %v1763_v24 = vld [vmem:[%s1994_s13 + $0x64] ss:$8 sps:$4 sm:$0xff]  }
 0x112   : > { %v1499_v27 = vpop.f32.mrb[12].mxu0  ;;  %v1571_v29 = vpop.f32.mrb[12].mxu1 }
 0x113   : > { %v1500_v28 = vpop.f32.mrb[13].mxu0  ;;  %v1572_v32 = vpop.f32.mrb[13].mxu1 }
 0x114   : > { %v2033_v30 = vadd.f32 %v1500_v28, %v1499_v27  ;;  %v1502_v31 = vpop.f32.mrb[14].mxu0  ;;  %v2035_v34 = vadd.f32 %v1572_v32, %v1571_v29  ;;  %v1574_v35 = vpop.f32.mrb[14].mxu1 }
 0x115   : > { %v1503_v33 = vpop.f32.mrb[15].mxu0  ;;  %v1575_v37 = vpop.f32.mrb[15].mxu1 }
 0x116   : > { %v2037_v36 = vadd.f32 %v1503_v33, %v1502_v31  ;;  %v2039_v38 = vadd.f32 %v1575_v37, %v1574_v35 }
 0x118   : > { %v821_v39 = vpack.c.bf16 %v2037_v36, %v2033_v30  ;;  %v833_v40 = vpack.c.bf16 %v2039_v38, %v2035_v34  ;;  %v1768_v30 = vld [vmem:[%s1994_s13 + $0x70] ss:$8 sps:$4 sm:$0xff]   ;;  %v2090_v38 = vld [vmem:[%s2155_s3] ss:$0 sm:$0xff] }
 0x11a   : > { %v1505_v41 = vpop.f32.mrb[16].mxu0 }
 0x11b   : > { %v1506_v42 = vpop.f32.mrb[17].mxu0 }
 0x11c   : > { %v2045_v43 = vadd.f32 %v1506_v42, %v1505_v41  ;;  %v1508_v44 = vpop.f32.mrb[18].mxu0 }
 0x11d   : > { %v1509_v45 = vpop.f32.mrb[19].mxu0 }
 0x11e   : > { %v1510_v46 = vadd.f32 %v1509_v45, %v1508_v44 }
 0x120   : > { %v822_v47 = vpack.c.bf16 %v1510_v46, %v2045_v43 }
 0x122   : > { %v1511_v48 = vpop.f32.mrb[20].mxu0 }
 0x123   : > { %v1512_v49 = vpop.f32.mrb[21].mxu0 }
 0x124   : > { %v1513_v50 = vadd.f32 %v1512_v49, %v1511_v48  ;;  %v1514_v51 = vpop.f32.mrb[22].mxu0 }
 0x125   : > { %v1515_v53 = vpop.f32.mrb[23].mxu0 }
 0x126   : > { %v1516_v54 = vadd.f32 %v1515_v53, %v1514_v51 }
 0x128   : > { %v823_v55 = vpack.c.bf16 %v1516_v54, %v1513_v50 }
 0x12a   : > { %v1517_v57 = vpop.f32.mrb[24].mxu0 }
 0x12b   : > { %v1518_v59 = vpop.f32.mrb[25].mxu0 }
 0x12c   : > { %v1519_v63 = vadd.f32 %v1518_v59, %v1517_v57  ;;  %v1520_v0 = vpop.f32.mrb[26].mxu0 }
 0x12d   : > { %v1521_v1 = vpop.f32.mrb[27].mxu0 }
 0x12e   : > { %v1522_v3 = vadd.f32 %v1521_v1, %v1520_v0 }
 0x130   : > { %v824_v4 = vpack.c.bf16 %v1522_v3, %v1519_v63 }
 0x132   : > { %v1523_v5 = vpop.f32.mrb[28].mxu0 }
 0x133   : > { %v1524_v7 = vpop.f32.mrb[29].mxu0 }
 0x134   : > { %v1525_v9 = vadd.f32 %v1524_v7, %v1523_v5  ;;  %v1526_v13 = vpop.f32.mrb[30].mxu0 }
 0x135   : > { %v1527_v14 = vpop.f32.mrb[31].mxu0 }
 0x136   : > { %v1528_v15 = vadd.f32 %v1527_v14, %v1526_v13 }
 0x138   : > { %v825_v17 = vpack.c.bf16 %v1528_v15, %v1525_v9 }
 0x13a   : > { %v1529_v18 = vpop.f32.mrb[32].mxu0 }
 0x13b   : > { %v1530_v19 = vpop.f32.mrb[33].mxu0 }
 0x13c   : > { %v1531_v21 = vadd.f32 %v1530_v19, %v1529_v18  ;;  %v1532_v23 = vpop.f32.mrb[34].mxu0 }
 0x13d   : > { %v1533_v27 = vpop.f32.mrb[35].mxu0 }
 0x13e   : > { %v1534_v28 = vadd.f32 %v1533_v27, %v1532_v23 }
 0x140   : > { %v826_v29 = vpack.c.bf16 %v1534_v28, %v1531_v21 }
 0x142   : > { %v1535_v31 = vpop.f32.mrb[36].mxu0  ;;  %1577 = vmatprep.subr.bf16.mxu1 %v826_v29 }
 0x143   : > { %v1536_v32 = vpop.f32.mrb[37].mxu0  ;;  %1578 = vmatpush3.bf16.msra.mxu1 %v818_v61 }
 0x144   : > { %v1537_v33 = vadd.f32 %v1536_v32, %v1535_v31  ;;  %v1538_v35 = vpop.f32.mrb[38].mxu0 }
 0x145   : > { %v1539_v37 = vpop.f32.mrb[39].mxu0 }
 0x146   : > { %v1540_v41 = vadd.f32 %v1539_v37, %v1538_v35 }
 0x148   : > { %v827_v42 = vpack.c.bf16 %v1540_v41, %v1537_v33 }
 0x14a   : > { %v1541_v43 = vpop.f32.mrb[40].mxu0  ;;  %1579 = vmatprep.subr.bf16.mxu1 %v827_v42 }
 0x14b   : > { %v1542_v44 = vpop.f32.mrb[41].mxu0  ;;  %1580 = vmatpush3.bf16.msra.mxu1 %v819_v11  ;;  %v1756_v11 = vld [vmem:[%s1994_s13 + $0x30] ss:$8 sps:$4 sm:$0xff]  }
 0x14c   : > { %v1543_v45 = vadd.f32 %v1542_v44, %v1541_v43  ;;  %v1544_v46 = vpop.f32.mrb[42].mxu0 }
 0x14d   : > { %v1545_v48 = vpop.f32.mrb[43].mxu0 }
 0x14e   : > { %v1546_v49 = vadd.f32 %v1545_v48, %v1544_v46 }
 0x150   : > { %v828_v50 = vpack.c.bf16 %v1546_v49, %v1543_v45 }
 0x152   : > { %v1547_v51 = vpop.f32.mrb[44].mxu0  ;;  %1581 = vmatprep.subr.bf16.mxu1 %v828_v50 }
 0x153   : > { %v1548_v52 = vpop.f32.mrb[45].mxu0  ;;  %1582 = vmatpush3.bf16.msra.mxu1 %v820_v25  ;;  %v1765_v25 = vld [vmem:[%s1994_s13 + $0x60] ss:$8 sps:$4 sm:$0xff]  }
 0x154   : > { %v1549_v58 = vadd.f32 %v1548_v52, %v1547_v51  ;;  %v1550_v61 = vpop.f32.mrb[46].mxu0 }
 0x155   : > { %v1551_v53 = vpop.f32.mrb[47].mxu0 }
 0x156   : > { %v1552_v54 = vadd.f32 %v1551_v53, %v1550_v61 }
 0x158   : > { %v829_v2 = vpack.c.bf16 %v1552_v54, %v1549_v58 }
 0x15a   : > { %1583 = vmatprep.subr.bf16.mxu1 %v829_v2 }
 0x15b   : > { %1584 = vmatpush3.bf16.msra.mxu1 %v821_v39 }
 0x15c   : > { %1585 = vmatprep.subr.bf16.mxu1 %v830_v62  ;;  %v1750_v62 = vld [vmem:[%s1994_s13 + $0x10] ss:$8 sps:$4 sm:$0xff]  }
 0x15f   : > { %1586 = vmatpush3.bf16.msra.mxu1 %v822_v47  ;;  %v2095_v47 = vld [vmem:[%s2156_s4] ss:$0 sm:$0xff] }
 0x160   : > { %1587 = vmatprep.subr.bf16.mxu1 %v831_v12  ;;  %v1757_v12 = vld [vmem:[%s1994_s13 + $0x44] ss:$8 sps:$4 sm:$0xff]  }
 0x163   : > { %1588 = vmatpush3.bf16.msra.mxu1 %v823_v55 }
 0x164   : > { %1589 = vmatprep.subr.bf16.mxu1 %v832_v26  ;;  %v1766_v26 = vld [vmem:[%s1994_s13 + $0x74] ss:$8 sps:$4 sm:$0xff]  }
 0x167   : > { %1590 = vmatpush3.bf16.msra.mxu1 %v824_v4 }
 0x168   : > { %1591 = vmatprep.subr.bf16.mxu1 %v833_v40 }
 0x16b   : > { %1592 = vmatpush3.bf16.msra.mxu1 %v825_v17 }
 0x16e   : > { %947 = vmatmul.mubr.bf16.vlgmr.msra.gmra.mrb[16].mxu1 %v1745_v56 }
 0x16f   : > { %954 = vmatprep.mubr.bf16.mxu1 %v1748_v60 }
 0x176   : > { %955 = vmatmul.mubr.bf16.gmra.mrb[20].mxu1 %v1750_v62 }
 0x177   : > { %962 = vmatprep.mubr.bf16.mxu1 %v1751_v6 }
 0x17e   : > { %963 = vmatmul.mubr.bf16.gmra.mrb[24].mxu1 %v1753_v8 }
 0x17f   : > { %970 = vmatprep.mubr.bf16.mxu1 %v1754_v10 }
 0x186   : > { %971 = vmatmul.mubr.bf16.gmra.mrb[28].mxu1 %v1756_v11 }
 0x187   : > { %978 = vmatprep.mubr.bf16.mxu1 %v1757_v12 }
 0x18e   : > { %979 = vmatmul.mubr.bf16.gmra.mrb[32].mxu1 %v1759_v16 }
 0x18f   : > { %986 = vmatprep.mubr.bf16.mxu1 %v1760_v20 }
 0x196   : > { %987 = vmatmul.mubr.bf16.gmra.mrb[36].mxu1 %v1762_v22 }
 0x197   : > { %994 = vmatprep.mubr.bf16.mxu1 %v1763_v24 }
 0x19e   : > { %995 = vmatmul.mubr.bf16.gmra.mrb[40].mxu1 %v1765_v25 }
 0x19f   : > { %1002 = vmatprep.mubr.bf16.mxu1 %v1766_v26 }
 0x1a6   : > { %1003 = vmatmul.mubr.bf16.gmra.mrb[44].mxu1 %v1768_v30 }
 0x241   : > { %v1593_v34 = vpop.f32.mrb[16].mxu1 }
 0x242   : > { %v1594_v36 = vpop.f32.mrb[17].mxu1 }
 0x243   : > { %v1595_v39 = vadd.f32 %v1594_v36, %v1593_v34  ;;  %v1596_v40 = vpop.f32.mrb[18].mxu1 }
 0x244   : > { %v1597_v55 = vpop.f32.mrb[19].mxu1 }
 0x245   : > { %v1069_v57 = vadd.f32 %v1595_v39, %v2090_v38  ;;  %v1598_v59 = vadd.f32 %v1597_v55, %v1596_v40 }
 0x247   : > { %v1108_v63 = vmul.f32 %v2095_v47, %v1069_v57  ;;  %v1070_v0 = vadd.f32 %v1598_v59, %v2090_v38  ;;  %vm1085_vm0 = vcmp.gt.f32.partialorder %v1069_v57, 0.0 }
 0x249   : > { %vm1086_vm1 = vcmp.gt.f32.partialorder %v1070_v0, 0.0  ;;  %v1109_v1 = vmul.f32 %v2095_v47, %v1070_v0  ;;  %v1599_v3 = vpop.f32.mrb[20].mxu1  ;;  %v1124_v5 = vsel %vm1085_vm0, %v1069_v57, %v1108_v63 }
 0x24a   : > { %v1600_v4 = vpop.f32.mrb[21].mxu1 }
 0x24b   : > { %v1125_v7 = vsel %vm1086_vm1, %v1070_v0, %v1109_v1  ;;  %v1601_v9 = vadd.f32 %v1600_v4, %v1599_v3  ;;  %v1602_v13 = vpop.f32.mrb[22].mxu1 }
 0x24c   : > { %v1421_v14 = vpack.c.bf16 %v1125_v7, %v1124_v5  ;;  %v1603_v15 = vpop.f32.mrb[23].mxu1 }
 0x24d   : > { %v1071_v17 = vadd.f32 %v1601_v9, %v2090_v38  ;;  %v1604_v18 = vadd.f32 %v1603_v15, %v1602_v13 }
 0x24e   : > { %1422 = vst [vmem:[%s2105_s24] sm:$0xff] %v1421_v14  }
 0x24f   : > { %v1110_v19 = vmul.f32 %v2095_v47, %v1071_v17  ;;  %v1072_v21 = vadd.f32 %v1604_v18, %v2090_v38  ;;  %vm1087_vm2 = vcmp.gt.f32.partialorder %v1071_v17, 0.0 }
 0x251   : > { %vm1088_vm3 = vcmp.gt.f32.partialorder %v1072_v21, 0.0  ;;  %v1111_v23 = vmul.f32 %v2095_v47, %v1072_v21  ;;  %v1605_v27 = vpop.f32.mrb[24].mxu1  ;;  %v1126_v29 = vsel %vm1087_vm2, %v1071_v17, %v1110_v19 }
 0x252   : > { %v1606_v28 = vpop.f32.mrb[25].mxu1 }
 0x253   : > { %v1127_v31 = vsel %vm1088_vm3, %v1072_v21, %v1111_v23  ;;  %v1607_v32 = vadd.f32 %v1606_v28, %v1605_v27  ;;  %v1608_v33 = vpop.f32.mrb[26].mxu1 }
 0x254   : > { %v1426_v35 = vpack.c.bf16 %v1127_v31, %v1126_v29  ;;  %v1609_v37 = vpop.f32.mrb[27].mxu1 }
 0x255   : > { %v1073_v41 = vadd.f32 %v1607_v32, %v2090_v38  ;;  %v1610_v42 = vadd.f32 %v1609_v37, %v1608_v33 }
 0x256   : > { %1458 = vst [vmem:[%s2105_s24 + $0x8] sm:$0xff] %v1426_v35  }
 0x257   : > { %v1112_v43 = vmul.f32 %v2095_v47, %v1073_v41  ;;  %v1074_v44 = vadd.f32 %v1610_v42, %v2090_v38  ;;  %vm1089_vm4 = vcmp.gt.f32.partialorder %v1073_v41, 0.0 }
 0x259   : > { %vm1090_vm5 = vcmp.gt.f32.partialorder %v1074_v44, 0.0  ;;  %v1113_v45 = vmul.f32 %v2095_v47, %v1074_v44  ;;  %v1611_v46 = vpop.f32.mrb[28].mxu1  ;;  %v1128_v49 = vsel %vm1089_vm4, %v1073_v41, %v1112_v43 }
 0x25a   : > { %v1612_v48 = vpop.f32.mrb[29].mxu1 }
 0x25b   : > { %v1129_v50 = vsel %vm1090_vm5, %v1074_v44, %v1113_v45  ;;  %v1613_v51 = vadd.f32 %v1612_v48, %v1611_v46  ;;  %v1614_v52 = vpop.f32.mrb[30].mxu1 }
 0x25c   : > { %v1431_v58 = vpack.c.bf16 %v1129_v50, %v1128_v49  ;;  %v1615_v61 = vpop.f32.mrb[31].mxu1 }
 0x25d   : > { %v1075_v53 = vadd.f32 %v1613_v51, %v2090_v38  ;;  %v1616_v54 = vadd.f32 %v1615_v61, %v1614_v52 }
 0x25e   : > { %1459 = vst [vmem:[%s2105_s24 + $0x10] sm:$0xff] %v1431_v58  }
 0x25f   : > { %v1114_v2 = vmul.f32 %v2095_v47, %v1075_v53  ;;  %v1076_v56 = vadd.f32 %v1616_v54, %v2090_v38  ;;  %vm1091_vm6 = vcmp.gt.f32.partialorder %v1075_v53, 0.0 }
 0x261   : > { %vm1092_vm7 = vcmp.gt.f32.partialorder %v1076_v56, 0.0  ;;  %v1115_v60 = vmul.f32 %v2095_v47, %v1076_v56  ;;  %v1617_v62 = vpop.f32.mrb[32].mxu1  ;;  %v1130_v8 = vsel %vm1091_vm6, %v1075_v53, %v1114_v2 }
 0x262   : > { %v1618_v6 = vpop.f32.mrb[33].mxu1 }
 0x263   : > { %v1131_v10 = vsel %vm1092_vm7, %v1076_v56, %v1115_v60  ;;  %v1619_v11 = vadd.f32 %v1618_v6, %v1617_v62  ;;  %v1620_v12 = vpop.f32.mrb[34].mxu1 }
 0x264   : > { %v1436_v16 = vpack.c.bf16 %v1131_v10, %v1130_v8  ;;  %v1621_v20 = vpop.f32.mrb[35].mxu1 }
 0x265   : > { %v1077_v22 = vadd.f32 %v1619_v11, %v2090_v38  ;;  %v1622_v24 = vadd.f32 %v1621_v20, %v1620_v12 }
 0x266   : > { %1460 = vst [vmem:[%s2105_s24 + $0x18] sm:$0xff] %v1436_v16  }
 0x267   : > { %v1116_v25 = vmul.f32 %v2095_v47, %v1077_v22  ;;  %v1078_v26 = vadd.f32 %v1622_v24, %v2090_v38  ;;  %vm1093_vm8 = vcmp.gt.f32.partialorder %v1077_v22, 0.0 }
 0x269   : > { %vm1094_vm9 = vcmp.gt.f32.partialorder %v1078_v26, 0.0  ;;  %v1117_v30 = vmul.f32 %v2095_v47, %v1078_v26  ;;  %v1623_v34 = vpop.f32.mrb[36].mxu1  ;;  %v1132_v39 = vsel %vm1093_vm8, %v1077_v22, %v1116_v25 }
 0x26a   : > { %v1624_v36 = vpop.f32.mrb[37].mxu1 }
 0x26b   : > { %v1133_v40 = vsel %vm1094_vm9, %v1078_v26, %v1117_v30  ;;  %v1625_v55 = vadd.f32 %v1624_v36, %v1623_v34  ;;  %v1626_v57 = vpop.f32.mrb[38].mxu1 }
 0x26c   : > { %v1441_v59 = vpack.c.bf16 %v1133_v40, %v1132_v39  ;;  %v1627_v63 = vpop.f32.mrb[39].mxu1 }
 0x26d   : > { %v1079_v0 = vadd.f32 %v1625_v55, %v2090_v38  ;;  %v1628_v1 = vadd.f32 %v1627_v63, %v1626_v57 }
 0x26e   : > { %1461 = vst [vmem:[%s2105_s24 + $0x20] sm:$0xff] %v1441_v59  }
 0x26f   : > { %v1118_v3 = vmul.f32 %v2095_v47, %v1079_v0  ;;  %v1080_v4 = vadd.f32 %v1628_v1, %v2090_v38  ;;  %vm1095_vm10 = vcmp.gt.f32.partialorder %v1079_v0, 0.0 }
 0x271   : > { %vm1096_vm11 = vcmp.gt.f32.partialorder %v1080_v4, 0.0  ;;  %v1119_v5 = vmul.f32 %v2095_v47, %v1080_v4  ;;  %v1629_v7 = vpop.f32.mrb[40].mxu1  ;;  %v1134_v13 = vsel %vm1095_vm10, %v1079_v0, %v1118_v3 }
 0x272   : > { %v1630_v9 = vpop.f32.mrb[41].mxu1 }
 0x273   : > { %v1135_v14 = vsel %vm1096_vm11, %v1080_v4, %v1119_v5  ;;  %v1631_v15 = vadd.f32 %v1630_v9, %v1629_v7  ;;  %v1632_v17 = vpop.f32.mrb[42].mxu1 }
 0x274   : > { %v1446_v18 = vpack.c.bf16 %v1135_v14, %v1134_v13  ;;  %v1633_v19 = vpop.f32.mrb[43].mxu1 }
 0x275   : > { %v1081_v21 = vadd.f32 %v1631_v15, %v2090_v38  ;;  %v1634_v23 = vadd.f32 %v1633_v19, %v1632_v17 }
 0x276   : > { %1462 = vst [vmem:[%s2105_s24 + $0x28] sm:$0xff] %v1446_v18  }
 0x277   : > { %v1120_v27 = vmul.f32 %v2095_v47, %v1081_v21  ;;  %v1082_v28 = vadd.f32 %v1634_v23, %v2090_v38  ;;  %vm1097_vm12 = vcmp.gt.f32.partialorder %v1081_v21, 0.0 }
 0x279   : > { %vm1098_vm13 = vcmp.gt.f32.partialorder %v1082_v28, 0.0  ;;  %v1121_v29 = vmul.f32 %v2095_v47, %v1082_v28  ;;  %v1635_v31 = vpop.f32.mrb[44].mxu1  ;;  %v1136_v33 = vsel %vm1097_vm12, %v1081_v21, %v1120_v27 }
 0x27a   : > { %v1636_v32 = vpop.f32.mrb[45].mxu1 }
 0x27b   : > { %v1137_v35 = vsel %vm1098_vm13, %v1082_v28, %v1121_v29  ;;  %v1637_v37 = vadd.f32 %v1636_v32, %v1635_v31  ;;  %v1638_v41 = vpop.f32.mrb[46].mxu1 }
 0x27c   : > { %v1451_v42 = vpack.c.bf16 %v1137_v35, %v1136_v33  ;;  %v1639_v43 = vpop.f32.mrb[47].mxu1 }
 0x27d   : > { %v1083_v44 = vadd.f32 %v1637_v37, %v2090_v38  ;;  %v1640_v45 = vadd.f32 %v1639_v43, %v1638_v41 }
 0x27e   : > { %1463 = vst [vmem:[%s2105_s24 + $0x30] sm:$0xff] %v1451_v42  }
 0x27f   : > { %v1122_v46 = vmul.f32 %v2095_v47, %v1083_v44  ;;  %v1084_v48 = vadd.f32 %v1640_v45, %v2090_v38  ;;  %vm1099_vm14 = vcmp.gt.f32.partialorder %v1083_v44, 0.0 }
 0x281   : > { %vm1100_vm15 = vcmp.gt.f32.partialorder %v1084_v48, 0.0  ;;  %v1123_v49 = vmul.f32 %v2095_v47, %v1084_v48  ;;  %v1138_v50 = vsel %vm1099_vm14, %v1083_v44, %v1122_v46 }
 0x283   : > { %v1139_v51 = vsel %vm1100_vm15, %v1084_v48, %v1123_v49 }
 0x284   : > { %v1456_v52 = vpack.c.bf16 %v1139_v51, %v1138_v50 }
 0x286   : > { %1464 = vst [vmem:[%s2105_s24 + $0x38] sm:$0xff] %v1456_v52  }
 0x287 PF: > { %s15_s20 = sadd.s32 1, %s1791_s20   ;;  %s2158_s18 = smov %s1787_s19 }
 0x288   : > { %p12_p5 = scmp.ge.s32.totalorder %s15_s20, 4   ;;  %s2159_s19 = smov %s2161_s21 }
 0x28a   :  { %14 = sbr.rel (!%p12_p5) target bundleno = 2 (0x2), region = 81 }

// kernel: gnn_net_forward.5
= control target key start
LH: loop header
LB: loop body
LE: loop exit
PB: predicated region body
PF: predicated region fallthrough
CT: control target
= control target key end

     0   :  { %s1255_s3 = inlined_call_operand.vmem [shape: bf16[128,128], index: 3, kind: input, shape index: {}]   ;;  %s1256_s1 = inlined_call_operand.vmem [shape: bf16[128,128], index: 1, kind: input, shape index: {}]   ;;  %s1257_s2 = inlined_call_operand.vmem [shape: bf16[128,128], index: 2, kind: input, shape index: {}]   ;;  %s1258_s0 = inlined_call_operand.vmem [shape: bf16[128,128], index: 0, kind: input, shape index: {}]   ;;  %s1259_s6 = inlined_call_operand.vmem [shape: bf16[128,128], index: 6, kind: input, shape index: {}]   ;;  %s1260_s4 = inlined_call_operand.vmem [shape: f32[1,128], index: 4, kind: input, shape index: {}]   ;;  %s1261_s5 = inlined_call_operand.vmem [shape: f32[1,128], index: 5, kind: input, shape index: {}]   ;;  %s1262_s7 = inlined_call_operand.vmem [shape: f32[1,128], index: 7, kind: input, shape index: {}]   ;;  %s1263_s8 = inlined_call_operand.vmem [shape: f32[128,128], index: 8, kind: output, shape index: {}]  }
   0x1   :  { %v957_v0 = vld [vmem:[%s1255_s3] sm:$0xff]   ;;  %v958_v1 = vld [vmem:[%s1255_s3 + $0x8] sm:$0xff]   ;;  %v959_v2 = vld [vmem:[%s1255_s3 + $0x10] sm:$0xff]  }
   0x2   :  { %845 = vmatprep.subr.bf16.mxu0 %v957_v0  ;;  %v960_v3 = vld [vmem:[%s1255_s3 + $0x18] sm:$0xff]   ;;  %v965_v4 = vld [vmem:[%s1256_s1] sm:$0xff]   ;;  %v962_v6 = vld [vmem:[%s1255_s3 + $0x28] sm:$0xff]  }
   0x3   :  { %846 = vmatpush3.bf16.msra.mxu0 %v957_v0  ;;  %861 = vmatprep.mubr.bf16.mxu0 %v965_v4  ;;  %v961_v5 = vld [vmem:[%s1255_s3 + $0x20] sm:$0xff]   ;;  %v963_v7 = vld [vmem:[%s1255_s3 + $0x30] sm:$0xff]   ;;  %v964_v8 = vld [vmem:[%s1255_s3 + $0x38] sm:$0xff]  }
   0x4   :  { %847 = vmatprep.subr.bf16.mxu0 %v958_v1  ;;  %v967_v9 = vld [vmem:[%s1257_s2] sm:$0xff]   ;;  %v966_v10 = vld [vmem:[%s1256_s1 + $0x8] sm:$0xff]   ;;  %v969_v12 = vld [vmem:[%s1256_s1 + $0x10] sm:$0xff]  }
   0x5   :  { %v968_v11 = vld [vmem:[%s1257_s2 + $0x8] sm:$0xff]   ;;  %v989_v13 = vld [vmem:[%s1259_s6] sm:$0xff]   ;;  %v971_v15 = vld [vmem:[%s1257_s2 + $0x10] sm:$0xff]  }
   0x6   :  { %v990_v14 = vld [vmem:[%s1259_s6 + $0x8] sm:$0xff]   ;;  %909 = vmatprep.subr.bf16.mxu1 %v989_v13  ;;  %v970_v16 = vld [vmem:[%s1256_s1 + $0x18] sm:$0xff]   ;;  %v991_v17 = vld [vmem:[%s1259_s6 + $0x10] sm:$0xff]  }
   0x7   :  { %848 = vmatpush3.bf16.msra.mxu0 %v958_v1  ;;  %910 = vmatpush3.bf16.msra.mxu1 %v989_v13  ;;  %v973_v18 = vld [vmem:[%s1256_s1 + $0x20] sm:$0xff]   ;;  %v972_v19 = vld [vmem:[%s1257_s2 + $0x18] sm:$0xff]   ;;  %v974_v23 = vld [vmem:[%s1256_s1 + $0x28] sm:$0xff]  }
   0x8   :  { %849 = vmatprep.subr.bf16.mxu0 %v959_v2  ;;  %911 = vmatprep.subr.bf16.mxu1 %v990_v14  ;;  %v992_v20 = vld [vmem:[%s1259_s6 + $0x18] sm:$0xff]   ;;  %v975_v21 = vld [vmem:[%s1257_s2 + $0x20] sm:$0xff]   ;;  %v977_v24 = vld [vmem:[%s1256_s1 + $0x30] sm:$0xff]  }
   0x9   :  { %v993_v22 = vld [vmem:[%s1259_s6 + $0x20] sm:$0xff]   ;;  %v976_v25 = vld [vmem:[%s1257_s2 + $0x28] sm:$0xff]   ;;  %v979_v26 = vld [vmem:[%s1257_s2 + $0x30] sm:$0xff]  }
   0xa   :  { %v978_v27 = vld [vmem:[%s1256_s1 + $0x38] sm:$0xff]   ;;  %v981_v28 = vld [vmem:[%s1258_s0] sm:$0xff]   ;;  %v982_v30 = vld [vmem:[%s1258_s0 + $0x8] sm:$0xff]  }
   0xb   :  { %850 = vmatpush3.bf16.msra.mxu0 %v959_v2  ;;  %912 = vmatpush3.bf16.msra.mxu1 %v990_v14  ;;  %v980_v29 = vld [vmem:[%s1257_s2 + $0x38] sm:$0xff]   ;;  %v983_v31 = vld [vmem:[%s1258_s0 + $0x10] sm:$0xff]   ;;  %v985_v33 = vld [vmem:[%s1258_s0 + $0x20] sm:$0xff]  }
   0xc   :  { %851 = vmatprep.subr.bf16.mxu0 %v960_v3  ;;  %913 = vmatprep.subr.bf16.mxu1 %v991_v17  ;;  %v984_v32 = vld [vmem:[%s1258_s0 + $0x18] sm:$0xff]   ;;  %v986_v34 = vld [vmem:[%s1258_s0 + $0x28] sm:$0xff]   ;;  %v987_v35 = vld [vmem:[%s1258_s0 + $0x30] sm:$0xff]  }
   0xd   :  { %v988_v36 = vld [vmem:[%s1258_s0 + $0x38] sm:$0xff]   ;;  %v994_v37 = vld [vmem:[%s1259_s6 + $0x28] sm:$0xff]   ;;  %v995_v38 = vld [vmem:[%s1259_s6 + $0x30] sm:$0xff]  }
   0xe   :  { %v996_v39 = vld [vmem:[%s1259_s6 + $0x38] sm:$0xff]   ;;  %v1165_v40 = vld [vmem:[%s1260_s4] ss:$0 sm:$0xff] }
   0xf   :  { %852 = vmatpush3.bf16.msra.mxu0 %v960_v3  ;;  %914 = vmatpush3.bf16.msra.mxu1 %v991_v17  ;;  %v1170_v42 = vld [vmem:[%s1261_s5] ss:$0 sm:$0xff] }
  0x10   :  { %853 = vmatprep.subr.bf16.mxu0 %v961_v5  ;;  %915 = vmatprep.subr.bf16.mxu1 %v992_v20 }
  0x13   :  { %854 = vmatpush3.bf16.msra.mxu0 %v961_v5  ;;  %916 = vmatpush3.bf16.msra.mxu1 %v992_v20 }
  0x14   :  { %855 = vmatprep.subr.bf16.mxu0 %v962_v6  ;;  %917 = vmatprep.subr.bf16.mxu1 %v993_v22 }
  0x17   :  { %856 = vmatpush3.bf16.msra.mxu0 %v962_v6  ;;  %918 = vmatpush3.bf16.msra.mxu1 %v993_v22 }
  0x18   :  { %857 = vmatprep.subr.bf16.mxu0 %v963_v7  ;;  %919 = vmatprep.subr.bf16.mxu1 %v994_v37 }
  0x1b   :  { %858 = vmatpush3.bf16.msra.mxu0 %v963_v7  ;;  %920 = vmatpush3.bf16.msra.mxu1 %v994_v37 }
  0x1c   :  { %859 = vmatprep.subr.bf16.mxu0 %v964_v8  ;;  %921 = vmatprep.subr.bf16.mxu1 %v995_v38 }
  0x1f   :  { %860 = vmatpush3.bf16.msra.mxu0 %v964_v8  ;;  %922 = vmatpush3.bf16.msra.mxu1 %v995_v38 }
  0x20   :  { %877 = vmatprep.subr.bf16.mxu0 %v967_v9  ;;  %923 = vmatprep.subr.bf16.mxu1 %v996_v39 }
  0x22   :  { %862 = vmatmul.mubr.bf16.vlgmr.msra.gmra.mrb[0].mxu0 %v966_v10 }
  0x23   :  { %878 = vmatpush3.bf16.msra.mxu0 %v967_v9  ;;  %865 = vmatprep.mubr.bf16.mxu0 %v969_v12 }
  0x24   :  { %879 = vmatprep.subr.bf16.mxu0 %v968_v11  ;;  %924 = vmatpush3.bf16.msra.mxu1 %v996_v39 }
  0x27   :  { %880 = vmatpush3.bf16.msra.mxu0 %v968_v11 }
  0x28   :  { %881 = vmatprep.subr.bf16.mxu0 %v971_v15 }
  0x2a   :  { %866 = vmatmul.mubr.bf16.gmra.mrb[4].mxu0 %v970_v16 }
  0x2b   :  { %882 = vmatpush3.bf16.msra.mxu0 %v971_v15  ;;  %869 = vmatprep.mubr.bf16.mxu0 %v973_v18 }
  0x2c   :  { %883 = vmatprep.subr.bf16.mxu0 %v972_v19 }
  0x2f   :  { %884 = vmatpush3.bf16.msra.mxu0 %v972_v19 }
  0x30   :  { %885 = vmatprep.subr.bf16.mxu0 %v975_v21 }
  0x32   :  { %870 = vmatmul.mubr.bf16.gmra.mrb[8].mxu0 %v974_v23 }
  0x33   :  { %886 = vmatpush3.bf16.msra.mxu0 %v975_v21  ;;  %873 = vmatprep.mubr.bf16.mxu0 %v977_v24 }
  0x34   :  { %887 = vmatprep.subr.bf16.mxu0 %v976_v25 }
  0x37   :  { %888 = vmatpush3.bf16.msra.mxu0 %v976_v25 }
  0x38   :  { %889 = vmatprep.subr.bf16.mxu0 %v979_v26 }
  0x3a   :  { %874 = vmatmul.mubr.bf16.gmra.mrb[12].mxu0 %v978_v27 }
  0x3b   :  { %890 = vmatpush3.bf16.msra.mxu0 %v979_v26  ;;  %893 = vmatprep.mubr.bf16.mxu0 %v981_v28 }
  0x3c   :  { %891 = vmatprep.subr.bf16.mxu0 %v980_v29 }
  0x3f   :  { %892 = vmatpush3.bf16.msra.mxu0 %v980_v29 }
  0x42   :  { %894 = vmatmul.mubr.bf16.vlgmr.msra.gmra.mrb[0].mxu0 %v982_v30 }
  0x43   :  { %897 = vmatprep.mubr.bf16.mxu0 %v983_v31 }
  0x4a   :  { %898 = vmatmul.mubr.bf16.gmra.mrb[4].mxu0 %v984_v32 }
  0x4b   :  { %901 = vmatprep.mubr.bf16.mxu0 %v985_v33 }
  0x52   :  { %902 = vmatmul.mubr.bf16.gmra.mrb[8].mxu0 %v986_v34 }
  0x53   :  { %905 = vmatprep.mubr.bf16.mxu0 %v987_v35 }
  0x5a   :  { %906 = vmatmul.mubr.bf16.gmra.mrb[12].mxu0 %v988_v36 }
 0x115   :  { %v895_v41 = vpop.f32.mrb[0].mxu0 }
 0x116   :  { %v489_v43 = vadd.f32 %v895_v41, %v1165_v40  ;;  %v417_v44 = vpop.f32.mrb[1].mxu0 }
 0x117   :  { %v487_v45 = vadd.f32 %v1165_v40, %v417_v44  ;;  %v896_v46 = vpop.f32.mrb[2].mxu0 }
 0x118   :  { %v528_v47 = vmul.f32 %v1170_v42, %v489_v43  ;;  %v490_v48 = vadd.f32 %v896_v46, %v1165_v40  ;;  %v420_v49 = vpop.f32.mrb[3].mxu0  ;;  %vm505_vm0 = vcmp.gt.f32.partialorder %v489_v43, 0.0 }
 0x119   :  { %v526_v50 = vmul.f32 %v1170_v42, %v487_v45  ;;  %v488_v51 = vadd.f32 %v1165_v40, %v420_v49  ;;  %vm503_vm2 = vcmp.gt.f32.partialorder %v487_v45, 0.0 }
 0x11a   :  { %vm506_vm1 = vcmp.gt.f32.partialorder %v490_v48, 0.0  ;;  %v529_v52 = vmul.f32 %v1170_v42, %v490_v48  ;;  %v544_v54 = vsel %vm505_vm0, %v489_v43, %v528_v47 }
 0x11b   :  { %v527_v53 = vmul.f32 %v1170_v42, %v488_v51  ;;  %vm504_vm3 = vcmp.gt.f32.partialorder %v488_v51, 0.0  ;;  %v542_v57 = vsel %vm503_vm2, %v487_v45, %v526_v50 }
 0x11c   :  { %v545_v55 = vsel %vm506_vm1, %v490_v48, %v529_v52 }
 0x11d   :  { %v899_v56 = vpop.f32.mrb[4].mxu0  ;;  %v543_v58 = vsel %vm504_vm3, %v488_v51, %v527_v53  ;;  %v559_v59 = vpack.c.bf16 %v545_v55, %v544_v54 }
 0x11e   :  { %v493_v60 = vadd.f32 %v899_v56, %v1165_v40  ;;  %v433_v61 = vpop.f32.mrb[5].mxu0  ;;  %v558_v62 = vpack.c.bf16 %v543_v58, %v542_v57 }
 0x11f   :  { %v491_v63 = vadd.f32 %v1165_v40, %v433_v61  ;;  %v900_v0 = vpop.f32.mrb[6].mxu0 }
 0x120   :  { %v532_v1 = vmul.f32 %v1170_v42, %v493_v60  ;;  %v494_v2 = vadd.f32 %v900_v0, %v1165_v40  ;;  %v436_v3 = vpop.f32.mrb[7].mxu0  ;;  %925 = vmatprep.mubr.bf16.mxu1 %v558_v62  ;;  %vm509_vm4 = vcmp.gt.f32.partialorder %v493_v60, 0.0 }
 0x121   :  { %v530_v4 = vmul.f32 %v1170_v42, %v491_v63  ;;  %v492_v5 = vadd.f32 %v1165_v40, %v436_v3  ;;  %926 = vmatmul.mubr.bf16.vlgmr.msra.gmra.mrb[0].mxu1 %v559_v59  ;;  %vm507_vm5 = vcmp.gt.f32.partialorder %v491_v63, 0.0 }
 0x122   :  { %vm510_vm6 = vcmp.gt.f32.partialorder %v494_v2, 0.0  ;;  %v533_v6 = vmul.f32 %v1170_v42, %v494_v2  ;;  %v548_v8 = vsel %vm509_vm4, %v493_v60, %v532_v1 }
 0x123   :  { %vm508_vm7 = vcmp.gt.f32.partialorder %v492_v5, 0.0  ;;  %v531_v7 = vmul.f32 %v1170_v42, %v492_v5  ;;  %v546_v11 = vsel %vm507_vm5, %v491_v63, %v530_v4 }
 0x124   :  { %v549_v9 = vsel %vm510_vm6, %v494_v2, %v533_v6 }
 0x125   :  { %v903_v10 = vpop.f32.mrb[8].mxu0  ;;  %v547_v12 = vsel %vm508_vm7, %v492_v5, %v531_v7  ;;  %v561_v13 = vpack.c.bf16 %v549_v9, %v548_v8 }
 0x126   :  { %v497_v14 = vadd.f32 %v903_v10, %v1165_v40  ;;  %v449_v15 = vpop.f32.mrb[9].mxu0  ;;  %v560_v16 = vpack.c.bf16 %v547_v12, %v546_v11 }
 0x127   :  { %v495_v17 = vadd.f32 %v1165_v40, %v449_v15  ;;  %v904_v18 = vpop.f32.mrb[10].mxu0 }
 0x128   :  { %v536_v19 = vmul.f32 %v1170_v42, %v497_v14  ;;  %v498_v20 = vadd.f32 %v904_v18, %v1165_v40  ;;  %v452_v21 = vpop.f32.mrb[11].mxu0  ;;  %929 = vmatprep.mubr.bf16.mxu1 %v560_v16  ;;  %vm513_vm8 = vcmp.gt.f32.partialorder %v497_v14, 0.0 }
 0x129   :  { %v534_v22 = vmul.f32 %v1170_v42, %v495_v17  ;;  %v496_v23 = vadd.f32 %v1165_v40, %v452_v21  ;;  %930 = vmatmul.mubr.bf16.gmra.mrb[4].mxu1 %v561_v13  ;;  %vm511_vm9 = vcmp.gt.f32.partialorder %v495_v17, 0.0 }
 0x12a   :  { %vm514_vm10 = vcmp.gt.f32.partialorder %v498_v20, 0.0  ;;  %v537_v24 = vmul.f32 %v1170_v42, %v498_v20  ;;  %v552_v26 = vsel %vm513_vm8, %v497_v14, %v536_v19 }
 0x12b   :  { %vm512_vm11 = vcmp.gt.f32.partialorder %v496_v23, 0.0  ;;  %v535_v25 = vmul.f32 %v1170_v42, %v496_v23  ;;  %v550_v29 = vsel %vm511_vm9, %v495_v17, %v534_v22 }
 0x12c   :  { %v553_v27 = vsel %vm514_vm10, %v498_v20, %v537_v24 }
 0x12d   :  { %v907_v28 = vpop.f32.mrb[12].mxu0  ;;  %v551_v30 = vsel %vm512_vm11, %v496_v23, %v535_v25  ;;  %v563_v31 = vpack.c.bf16 %v553_v27, %v552_v26 }
 0x12e   :  { %v501_v32 = vadd.f32 %v907_v28, %v1165_v40  ;;  %v465_v33 = vpop.f32.mrb[13].mxu0  ;;  %v562_v34 = vpack.c.bf16 %v551_v30, %v550_v29 }
 0x12f   :  { %v499_v35 = vadd.f32 %v1165_v40, %v465_v33  ;;  %v908_v36 = vpop.f32.mrb[14].mxu0 }
 0x130   :  { %v540_v37 = vmul.f32 %v1170_v42, %v501_v32  ;;  %v502_v38 = vadd.f32 %v908_v36, %v1165_v40  ;;  %v468_v39 = vpop.f32.mrb[15].mxu0  ;;  %933 = vmatprep.mubr.bf16.mxu1 %v562_v34  ;;  %vm517_vm12 = vcmp.gt.f32.partialorder %v501_v32, 0.0 }
 0x131   :  { %v538_v41 = vmul.f32 %v1170_v42, %v499_v35  ;;  %v500_v43 = vadd.f32 %v1165_v40, %v468_v39  ;;  %934 = vmatmul.mubr.bf16.gmra.mrb[8].mxu1 %v563_v31  ;;  %vm515_vm13 = vcmp.gt.f32.partialorder %v499_v35, 0.0  ;;  %v788_v40 = vld [vmem:[%s1262_s7] ss:$0 sm:$0xff] }
 0x132   :  { %vm518_vm14 = vcmp.gt.f32.partialorder %v502_v38, 0.0  ;;  %v541_v44 = vmul.f32 %v1170_v42, %v502_v38  ;;  %v556_v46 = vsel %vm517_vm12, %v501_v32, %v540_v37 }
 0x133   :  { %vm516_vm15 = vcmp.gt.f32.partialorder %v500_v43, 0.0  ;;  %v539_v45 = vmul.f32 %v1170_v42, %v500_v43  ;;  %v554_v48 = vsel %vm515_vm13, %v499_v35, %v538_v41 }
 0x134   :  { %v557_v47 = vsel %vm518_vm14, %v502_v38, %v541_v44 }
 0x135   :  { %v555_v49 = vsel %vm516_vm15, %v500_v43, %v539_v45  ;;  %v565_v50 = vpack.c.bf16 %v557_v47, %v556_v46 }
 0x136   :  { %v564_v51 = vpack.c.bf16 %v555_v49, %v554_v48 }
 0x138   :  { %937 = vmatprep.mubr.bf16.mxu1 %v564_v51 }
 0x139   :  { %938 = vmatmul.mubr.bf16.gmra.mrb[12].mxu1 %v565_v50 }
 0x1f4   :  { %v927_v52 = vpop.f32.mrb[0].mxu1 }
 0x1f5   :  { %v680_v53 = vadd.f32 %v927_v52, %v788_v40  ;;  %v671_v54 = vpop.f32.mrb[1].mxu1 }
 0x1f6   :  { %v672_v55 = vadd.f32 %v788_v40, %v671_v54  ;;  %v928_v56 = vpop.f32.mrb[2].mxu1 }
 0x1f7   :  { %736 = vst [vmem:[%s1263_s8 + $0x10] sm:$0xff] %v680_v53  ;;  %v683_v42 = vadd.f32 %v928_v56, %v788_v40  ;;  %v674_v57 = vpop.f32.mrb[3].mxu1 }
 0x1f8   :  { %734 = vst [vmem:[%s1263_s8] sm:$0xff] %v672_v55  ;;  %v675_v58 = vadd.f32 %v788_v40, %v674_v57 }
 0x1f9   :  { %737 = vst [vmem:[%s1263_s8 + $0x18] sm:$0xff] %v683_v42 }
 0x1fa   :  { %735 = vst [vmem:[%s1263_s8 + $0x8] sm:$0xff] %v675_v58 }
 0x1fc   :  { %v931_v59 = vpop.f32.mrb[4].mxu1 }
 0x1fd   :  { %v696_v60 = vadd.f32 %v931_v59, %v788_v40  ;;  %v687_v61 = vpop.f32.mrb[5].mxu1 }
 0x1fe   :  { %v688_v62 = vadd.f32 %v788_v40, %v687_v61  ;;  %v932_v63 = vpop.f32.mrb[6].mxu1 }
 0x1ff   :  { %740 = vst [vmem:[%s1263_s8 + $0x30] sm:$0xff] %v696_v60  ;;  %v699_v0 = vadd.f32 %v932_v63, %v788_v40  ;;  %v690_v1 = vpop.f32.mrb[7].mxu1 }
 0x200   :  { %738 = vst [vmem:[%s1263_s8 + $0x20] sm:$0xff] %v688_v62  ;;  %v691_v2 = vadd.f32 %v788_v40, %v690_v1 }
 0x201   :  { %741 = vst [vmem:[%s1263_s8 + $0x38] sm:$0xff] %v699_v0 }
 0x202   :  { %739 = vst [vmem:[%s1263_s8 + $0x28] sm:$0xff] %v691_v2 }
 0x204   :  { %v935_v3 = vpop.f32.mrb[8].mxu1 }
 0x205   :  { %v712_v4 = vadd.f32 %v935_v3, %v788_v40  ;;  %v703_v5 = vpop.f32.mrb[9].mxu1 }
 0x206   :  { %v704_v6 = vadd.f32 %v788_v40, %v703_v5  ;;  %v936_v7 = vpop.f32.mrb[10].mxu1 }
 0x207   :  { %744 = vst [vmem:[%s1263_s8 + $0x50] sm:$0xff] %v712_v4  ;;  %v715_v8 = vadd.f32 %v936_v7, %v788_v40  ;;  %v706_v9 = vpop.f32.mrb[11].mxu1 }
 0x208   :  { %742 = vst [vmem:[%s1263_s8 + $0x40] sm:$0xff] %v704_v6  ;;  %v707_v10 = vadd.f32 %v788_v40, %v706_v9 }
 0x209   :  { %745 = vst [vmem:[%s1263_s8 + $0x58] sm:$0xff] %v715_v8 }
 0x20a   :  { %743 = vst [vmem:[%s1263_s8 + $0x48] sm:$0xff] %v707_v10 }
 0x20c   :  { %v939_v11 = vpop.f32.mrb[12].mxu1 }
 0x20d   :  { %v728_v12 = vadd.f32 %v939_v11, %v788_v40  ;;  %v719_v13 = vpop.f32.mrb[13].mxu1 }
 0x20e   :  { %v720_v14 = vadd.f32 %v788_v40, %v719_v13  ;;  %v940_v15 = vpop.f32.mrb[14].mxu1 }
 0x20f   :  { %748 = vst [vmem:[%s1263_s8 + $0x70] sm:$0xff] %v728_v12  ;;  %v731_v16 = vadd.f32 %v940_v15, %v788_v40  ;;  %v722_v17 = vpop.f32.mrb[15].mxu1 }
 0x210   :  { %746 = vst [vmem:[%s1263_s8 + $0x60] sm:$0xff] %v720_v14  ;;  %v723_v18 = vadd.f32 %v788_v40, %v722_v17 }
 0x211   :  { %749 = vst [vmem:[%s1263_s8 + $0x78] sm:$0xff] %v731_v16 }
 0x212   :  { %747 = vst [vmem:[%s1263_s8 + $0x68] sm:$0xff] %v723_v18 }

</bundles_post_ra>
